<compile_context>
chip_gen: v7x
topology: tpu7x:2x2x1
jax: 0.10.0
libtpu: 0.0.40
codegen_flags: <defaults>
</compile_context>

<pallas_src>
import functools

import jax
import jax.numpy as jnp
from jax import lax
from jax.experimental import pallas as pl
from jax.experimental.pallas import tpu as pltpu


def _attention_kernel(x_ref, wq_ref, wk_ref, wv_ref, wproj_ref, bproj_ref,
                      out_ref, attn_ref, acc_ref, *, scale, n_valid):
    """One (batch, head) grid step of the fused attention forward.

    x_ref:     (1, Np, C)    padded tokens (MXU dtype, typically bf16)
    wq/wk/wv:  (1, C, D)     per-head projection weight slices
    wproj_ref: (1, D, C)     per-head row-slice of the output projection
    bproj_ref: (1, C)        output projection bias (f32)
    out_ref:   (1, Np, C)    output block (same block for every head -> resident)
    attn_ref:  (1, 1, Np, Np) attention probabilities for this (b, h)
    acc_ref:   (Np, C) f32   VMEM accumulator for the head-summed projection
    """
    h = pl.program_id(1)

    @pl.when(h == 0)
    def _init():
        acc_ref[...] = jnp.zeros_like(acc_ref)

    x = x_ref[0]                                                      # (Np, C)

    # Per-head q/k/v straight out of full-C contractions (lane-dense results,
    # f32 accumulation on the MXU).  Softmax scale folded into q.
    q = jnp.dot(x, wq_ref[0], preferred_element_type=jnp.float32) * scale
    k = jnp.dot(x, wk_ref[0], preferred_element_type=jnp.float32)
    v = jnp.dot(x, wv_ref[0], preferred_element_type=jnp.float32)

    # scores = q @ k.T  (contract the head dim; no explicit transpose).
    s = lax.dot_general(q.astype(x.dtype), k.astype(x.dtype),
                        (((1,), (1,)), ((), ())),
                        preferred_element_type=jnp.float32)           # (Np, Np)

    n_pad = s.shape[-1]
    if n_pad > n_valid:  # static: mask padded key columns out of the softmax
        key_idx = lax.broadcasted_iota(jnp.int32, s.shape, 1)
        s = jnp.where(key_idx < n_valid, s, -1e30)

    # Softmax in f32; the divide runs on the EUP via an approx reciprocal.
    s = s - jnp.max(s, axis=-1, keepdims=True)
    p = jnp.exp(s)
    p = p * pl.reciprocal(jnp.sum(p, axis=-1, keepdims=True), approx=True)

    # attn_drop has p=0.0 -> identity; store the probabilities directly.
    attn_ref[0, 0] = p.astype(attn_ref.dtype)

    # Per-head context and its fused contribution to the output projection.
    # All stores here are full-C lane-dense; no head_dim-wide column writes.
    ctx = jnp.dot(p.astype(x.dtype), v.astype(x.dtype),
                  preferred_element_type=jnp.float32)                 # (Np, D)
    acc_ref[...] += jnp.dot(ctx.astype(x.dtype), wproj_ref[0],
                            preferred_element_type=jnp.float32)       # (Np, C)

    @pl.when(h == pl.num_programs(1) - 1)
    def _finalize():
        # proj_drop has p=0.0 -> identity.
        out_ref[0] = (acc_ref[...] + bproj_ref[...]).astype(out_ref.dtype)


def attention_forward(x, qkv_weight, proj_weight, proj_bias, *,
                      num_heads, qk_scale=None, mask=None,
                      mxu_dtype=jnp.bfloat16):
    """Pallas forward of the Attention module.  Returns (out, attn)."""
    # TODO(synk): boolean key-padding `mask` (masked_fill with -inf) and
    # qkv_bias=True are not implemented; module defaults (mask=None,
    # qkv_bias=False) are supported.
    assert mask is None, "mask path not implemented"

    B, N, C = x.shape
    assert C % num_heads == 0, "dim must be divisible by num_heads"
    D = C // num_heads
    scale = float(qk_scale) if qk_scale is not None else D ** (-0.5)

    out_dtype = x.dtype
    attn_dtype = x.dtype

    # Pad N to a lane-dense multiple of 128 so all score/attn/out stores are
    # unmasked full-lane stores; padded keys are masked inside the kernel.
    Np = max(128, ((N + 127) // 128) * 128)
    x_p = x if Np == N else jnp.pad(x, ((0, 0), (0, Np - N), (0, 0)))
    x_p = x_p.astype(mxu_dtype)

    # Host-side weight prep: per-head column slices of the qkv weight and
    # per-head row slices of the proj weight, pre-transposed for plain matmuls.
    wqkv_t = qkv_weight.T.reshape(C, 3, num_heads, D)                  # (C,3,H,D)
    wq = jnp.transpose(wqkv_t[:, 0], (1, 0, 2)).astype(mxu_dtype)      # (H, C, D)
    wk = jnp.transpose(wqkv_t[:, 1], (1, 0, 2)).astype(mxu_dtype)      # (H, C, D)
    wv = jnp.transpose(wqkv_t[:, 2], (1, 0, 2)).astype(mxu_dtype)      # (H, C, D)
    wproj_h = proj_weight.T.reshape(num_heads, D, C).astype(mxu_dtype)  # (H, D, C)
    bproj = proj_bias.reshape(1, C).astype(jnp.float32)                # (1, C)

    kernel = functools.partial(_attention_kernel, scale=scale, n_valid=N)

    # --- VMEM budget (double-buffered ins/outs + persistent scratch +
    #     headroom for the f32 score/prob/qkv intermediates), capped so it
    #     also fits a v7x TensorCore (64 MiB physical VMEM). ---
    in_item = jnp.dtype(mxu_dtype).itemsize
    f32b = 4
    x_blk = Np * C * in_item
    w_blk = 3 * C * D * in_item
    wp_blk = D * C * in_item
    b_blk = C * f32b
    attn_blk = Np * Np * jnp.dtype(attn_dtype).itemsize
    out_blk = Np * C * jnp.dtype(out_dtype).itemsize
    acc_blk = Np * C * f32b
    vmem_needed = (2 * (x_blk + w_blk + wp_blk + b_blk + attn_blk + out_blk)
                   + acc_blk + 4 * Np * Np * f32b + 6 * Np * D * f32b)
    vmem_limit = int(min(64 * 2 ** 20, max(32 * 2 ** 20, vmem_needed)))

    # Advisory cost hint for XLA scheduling around the custom call.
    flops = (2 * B * num_heads * Np * C * 3 * D        # q/k/v projections
             + 4 * B * num_heads * Np * Np * D         # scores + attn @ v
             + 2 * B * num_heads * Np * D * C)         # fused output projection
    transcendentals = B * num_heads * Np * Np
    bytes_accessed = (B * Np * C * (in_item + jnp.dtype(out_dtype).itemsize)
                      + num_heads * (3 * C * D + D * C) * in_item + C * f32b
                      + B * num_heads * Np * Np * jnp.dtype(attn_dtype).itemsize)

    out, attn = pl.pallas_call(
        kernel,
        grid=(B, num_heads),
        in_specs=[
            pl.BlockSpec((1, Np, C), lambda b, h: (b, 0, 0)),
            pl.BlockSpec((1, C, D), lambda b, h: (h, 0, 0)),
            pl.BlockSpec((1, C, D), lambda b, h: (h, 0, 0)),
            pl.BlockSpec((1, C, D), lambda b, h: (h, 0, 0)),
            pl.BlockSpec((1, D, C), lambda b, h: (h, 0, 0)),
            pl.BlockSpec((1, C), lambda b, h: (0, 0)),
        ],
        out_specs=(
            # Output block is constant across the head axis -> stays resident
            # in VMEM and is accumulated (head axis marked "arbitrary").
            pl.BlockSpec((1, Np, C), lambda b, h: (b, 0, 0)),
            pl.BlockSpec((1, 1, Np, Np), lambda b, h: (b, h, 0, 0)),
        ),
        out_shape=(
            jax.ShapeDtypeStruct((B, Np, C), out_dtype),
            jax.ShapeDtypeStruct((B, num_heads, Np, Np), attn_dtype),
        ),
        scratch_shapes=[pltpu.VMEM((Np, C), jnp.float32)],
        compiler_params=pltpu.CompilerParams(
            dimension_semantics=("parallel", "arbitrary"),
            vmem_limit_bytes=vmem_limit,
        ),
        cost_estimate=pl.CostEstimate(
            flops=flops,
            transcendentals=transcendentals,
            bytes_accessed=bytes_accessed,
        ),
    )(x_p, wq, wk, wv, wproj_h, bproj)

    if Np != N:
        out = out[:, :N, :]
        attn = attn[:, :, :N, :N]
    return out, attn


def _attention_reference(x, qkv_weight, proj_weight, proj_bias, num_heads, scale):
    """Pure-JAX reference matching the PyTorch module (inference, mask=None)."""
    B, N, C = x.shape
    D = C // num_heads
    qkv = jnp.einsum('bnc,dc->bnd', x, qkv_weight)                # (B, N, 3C)
    qkv = qkv.reshape(B, N, 3, num_heads, D).transpose(2, 0, 3, 1, 4)
    q, k, v = qkv[0], qkv[1], qkv[2]                              # (B, H, N, D)
    attn = jnp.einsum('bhnd,bhmd->bhnm', q, k) * scale
    attn = jax.nn.softmax(attn, axis=-1)
    out = jnp.einsum('bhnm,bhmd->bhnd', attn, v)
    out = out.transpose(0, 2, 1, 3).reshape(B, N, C)
    out = out @ proj_weight.T + proj_bias
    return out, attn


if __name__ == "__main__":
    key = jax.random.PRNGKey(0)
    k1, k2, k3, k4 = jax.random.split(key, 4)

    batch, seq, dim, num_heads = 2, 8, 64, 8
    head_dim = dim // num_heads

    x = jax.random.normal(k1, (batch, seq, dim), dtype=jnp.float32)
    qkv_weight = jax.random.normal(k2, (3 * dim, dim), dtype=jnp.float32) * (dim ** -0.5)
    proj_weight = jax.random.normal(k3, (dim, dim), dtype=jnp.float32) * (dim ** -0.5)
    proj_bias = jax.random.normal(k4, (dim,), dtype=jnp.float32) * 0.02

    out_exp, attn_exp = _attention_reference(
        x, qkv_weight, proj_weight, proj_bias, num_heads, head_dim ** (-0.5))

    # f32-MXU path: tight structural check against the full-precision reference.
    out32, attn32 = attention_forward(x, qkv_weight, proj_weight, proj_bias,
                                      num_heads=num_heads, mxu_dtype=jnp.float32)
    jax.block_until_ready((out32, attn32))
    assert out32.shape == (batch, seq, dim)
    assert attn32.shape == (batch, num_heads, seq, seq)
    assert jnp.allclose(out32, out_exp, atol=2e-2, rtol=2e-2), "f32 output mismatch"
    assert jnp.allclose(attn32, attn_exp, atol=2e-2, rtol=2e-2), "f32 attention mismatch"

    # Default bf16-MXU path (performance config): looser tolerance by design.
    out16, attn16 = attention_forward(x, qkv_weight, proj_weight, proj_bias,
                                      num_heads=num_heads)
    jax.block_until_ready((out16, attn16))
    assert out16.shape == (batch, seq, dim)
    assert attn16.shape == (batch, num_heads, seq, seq)
    assert jnp.allclose(out16, out_exp, atol=1e-1, rtol=1e-1), "bf16 output mismatch"
    assert jnp.allclose(attn16, attn_exp, atol=1e-1, rtol=1e-1), "bf16 attention mismatch"

    print("KERNEL_OK")
</pallas_src>

<mosaic_0001>
module attributes {stable_mosaic.version = 11 : i64} {
  func.func @_attention_kernel(%arg0: i32, %arg1: i32, %arg2: memref<1x128x64xf32, #tpu.memory_space<vmem>>, %arg3: memref<1x64x8xf32, #tpu.memory_space<vmem>>, %arg4: memref<1x64x8xf32, #tpu.memory_space<vmem>>, %arg5: memref<1x64x8xf32, #tpu.memory_space<vmem>>, %arg6: memref<1x8x64xf32, #tpu.memory_space<vmem>>, %arg7: memref<1x64xf32, #tpu.memory_space<vmem>>, %arg8: memref<1x128x64xf32, #tpu.memory_space<vmem>>, %arg9: memref<1x1x128x128xf32, #tpu.memory_space<vmem>>, %arg10: memref<128x64xf32, #tpu.memory_space<vmem>>) attributes {dimension_semantics = [#tpu.dimension_semantics<parallel>, #tpu.dimension_semantics<arbitrary>], iteration_bounds = array<i64: 2, 8>, scalar_prefetch = 0 : i64, scratch_operands = 1 : i64, tpu.core_type = #tpu.core_type<tc>, window_params = [{transform_indices = @transform_0, window_bounds = array<i64: 1, 128, 64>}, {transform_indices = @transform_1, window_bounds = array<i64: 1, 64, 8>}, {transform_indices = @transform_2, window_bounds = array<i64: 1, 64, 8>}, {transform_indices = @transform_3, window_bounds = array<i64: 1, 64, 8>}, {transform_indices = @transform_4, window_bounds = array<i64: 1, 8, 64>}, {pipeline_mode = #tpu.pipeline_mode<synchronous>, transform_indices = @transform_5, window_bounds = array<i64: 1, 64>}, {transform_indices = @transform_6, window_bounds = array<i64: 1, 128, 64>}, {transform_indices = @transform_7, window_bounds = array<i64: 1, 1, 128, 128>}]} {
    %c0_i32 = arith.constant 0 : i32
    %0 = arith.cmpi eq, %arg1, %c0_i32 : i32
    %1 = arith.extui %0 : i1 to i32
    %c0_i32_0 = arith.constant 0 : i32
    %2 = arith.cmpi ne, %1, %c0_i32_0 : i32
    scf.if %2 {
      %cst_33 = arith.constant 0.000000e+00 : f32
      %45 = vector.broadcast %cst_33 : f32 to vector<128x64xf32>
      %c0_34 = arith.constant 0 : index
      %c0_35 = arith.constant 0 : index
      %46 = vector.load %arg10[%c0_34, %c0_35] : memref<128x64xf32, #tpu.memory_space<vmem>>, vector<128x64xf32>
      tpu.vector_store %arg10[%c0_34, %c0_35], %45 {strides = array<i32>} : memref<128x64xf32, #tpu.memory_space<vmem>>, vector<128x64xf32>,
    } else {
    }
    %c0 = arith.constant 0 : index
    %c0_1 = arith.constant 0 : index
    %c0_2 = arith.constant 0 : index
    %3 = vector.load %arg2[%c0, %c0_1, %c0_2] : memref<1x128x64xf32, #tpu.memory_space<vmem>>, vector<1x128x64xf32>
    %4 = vector.shape_cast %3 : vector<1x128x64xf32> to vector<128x64xf32>
    %c0_3 = arith.constant 0 : index
    %c0_4 = arith.constant 0 : index
    %c0_5 = arith.constant 0 : index
    %5 = vector.load %arg3[%c0_3, %c0_4, %c0_5] : memref<1x64x8xf32, #tpu.memory_space<vmem>>, vector<1x64x8xf32>
    %6 = vector.shape_cast %5 : vector<1x64x8xf32> to vector<64x8xf32>
    %cst = arith.constant dense<0.000000e+00> : vector<128x8xf32>
    %7 = tpu.matmul %4, %6, %cst {dimension_numbers = #tpu.dot_dimension_numbers<[1], [0], [0], [1], [0, 0, 1, 1], [], []>} : vector<128x64xf32>, vector<64x8xf32>, vector<128x8xf32> -> vector<128x8xf32>
    %cst_6 = arith.constant 0.353553385 : f32
    %8 = vector.broadcast %cst_6 : f32 to vector<128x8xf32>
    %9 = arith.mulf %7, %8 : vector<128x8xf32>
    %c0_7 = arith.constant 0 : index
    %c0_8 = arith.constant 0 : index
    %c0_9 = arith.constant 0 : index
    %10 = vector.load %arg4[%c0_7, %c0_8, %c0_9] : memref<1x64x8xf32, #tpu.memory_space<vmem>>, vector<1x64x8xf32>
    %11 = vector.shape_cast %10 : vector<1x64x8xf32> to vector<64x8xf32>
    %cst_10 = arith.constant dense<0.000000e+00> : vector<128x8xf32>
    %12 = tpu.matmul %4, %11, %cst_10 {dimension_numbers = #tpu.dot_dimension_numbers<[1], [0], [0], [1], [0, 0, 1, 1], [], []>} : vector<128x64xf32>, vector<64x8xf32>, vector<128x8xf32> -> vector<128x8xf32>
    %c0_11 = arith.constant 0 : index
    %c0_12 = arith.constant 0 : index
    %c0_13 = arith.constant 0 : index
    %13 = vector.load %arg5[%c0_11, %c0_12, %c0_13] : memref<1x64x8xf32, #tpu.memory_space<vmem>>, vector<1x64x8xf32>
    %14 = vector.shape_cast %13 : vector<1x64x8xf32> to vector<64x8xf32>
    %cst_14 = arith.constant dense<0.000000e+00> : vector<128x8xf32>
    %15 = tpu.matmul %4, %14, %cst_14 {dimension_numbers = #tpu.dot_dimension_numbers<[1], [0], [0], [1], [0, 0, 1, 1], [], []>} : vector<128x64xf32>, vector<64x8xf32>, vector<128x8xf32> -> vector<128x8xf32>
    %cst_15 = arith.constant dense<0.000000e+00> : vector<128x128xf32>
    %16 = tpu.matmul %9, %12, %cst_15 {dimension_numbers = #tpu.dot_dimension_numbers<[1], [1], [0], [0], [0, 0, 1, 0], [], []>} : vector<128x8xf32>, vector<128x8xf32>, vector<128x128xf32> -> vector<128x128xf32>
    %17 = tpu.iota {dimensions = array<i32: 1>} : vector<128x128xi32>
    %c8_i32 = arith.constant 8 : i32
    %18 = vector.broadcast %c8_i32 : i32 to vector<128x128xi32>
    %19 = arith.cmpi slt, %17, %18 : vector<128x128xi32>
    %cst_16 = arith.constant -1.000000e+30 : f32
    %20 = vector.broadcast %cst_16 : f32 to vector<128x128xf32>
    %21 = arith.select %19, %16, %20 : vector<128x128xi1>, vector<128x128xf32>
    %cst_17 = arith.constant dense<0xFF800000> : vector<128xf32>
    %22 = vector.multi_reduction <maximumf>, %21, %cst_17 [1] : vector<128x128xf32> to vector<128xf32>
    %23 = vector.shape_cast %22 : vector<128xf32> to vector<128x1xf32>
    %24 = vector.broadcast %23 : vector<128x1xf32> to vector<128x128xf32>
    %25 = arith.subf %21, %24 : vector<128x128xf32>
    %26 = math.exp %25 : vector<128x128xf32>
    %cst_18 = arith.constant dense<0.000000e+00> : vector<128xf32>
    %27 = vector.multi_reduction <add>, %26, %cst_18 [1] : vector<128x128xf32> to vector<128xf32>
    %28 = vector.shape_cast %27 : vector<128xf32> to vector<128x1xf32>
    %29 = tpu.reciprocal %28 {approx = true} : vector<128x1xf32> -> vector<128x1xf32>
    %30 = vector.broadcast %29 : vector<128x1xf32> to vector<128x128xf32>
    %31 = arith.mulf %26, %30 : vector<128x128xf32>
    %c0_19 = arith.constant 0 : index
    %c0_20 = arith.constant 0 : index
    %c0_21 = arith.constant 0 : index
    %c0_22 = arith.constant 0 : index
    %32 = vector.load %arg9[%c0_19, %c0_20, %c0_21, %c0_22] : memref<1x1x128x128xf32, #tpu.memory_space<vmem>>, vector<1x1x128x128xf32>
    %33 = vector.shape_cast %32 : vector<1x1x128x128xf32> to vector<128x128xf32>
    %34 = vector.shape_cast %31 : vector<128x128xf32> to vector<1x1x128x128xf32>
    tpu.vector_store %arg9[%c0_19, %c0_20, %c0_21, %c0_22], %34 {strides = array<i32>} : memref<1x1x128x128xf32, #tpu.memory_space<vmem>>, vector<1x1x128x128xf32>,
    %cst_23 = arith.constant dense<0.000000e+00> : vector<128x8xf32>
    %35 = tpu.matmul %31, %15, %cst_23 {dimension_numbers = #tpu.dot_dimension_numbers<[1], [0], [0], [1], [0, 0, 1, 1], [], []>} : vector<128x128xf32>, vector<128x8xf32>, vector<128x8xf32> -> vector<128x8xf32>
    %c0_24 = arith.constant 0 : index
    %c0_25 = arith.constant 0 : index
    %36 = vector.load %arg10[%c0_24, %c0_25] : memref<128x64xf32, #tpu.memory_space<vmem>>, vector<128x64xf32>
    %c0_26 = arith.constant 0 : index
    %c0_27 = arith.constant 0 : index
    %c0_28 = arith.constant 0 : index
    %37 = vector.load %arg6[%c0_26, %c0_27, %c0_28] : memref<1x8x64xf32, #tpu.memory_space<vmem>>, vector<1x8x64xf32>
    %38 = vector.shape_cast %37 : vector<1x8x64xf32> to vector<8x64xf32>
    %cst_29 = arith.constant dense<0.000000e+00> : vector<128x64xf32>
    %39 = tpu.matmul %35, %38, %cst_29 {dimension_numbers = #tpu.dot_dimension_numbers<[1], [0], [0], [1], [0, 0, 1, 1], [], []>} : vector<128x8xf32>, vector<8x64xf32>, vector<128x64xf32> -> vector<128x64xf32>
    %40 = arith.addf %36, %39 : vector<128x64xf32>
    %c0_30 = arith.constant 0 : index
    %c0_31 = arith.constant 0 : index
    %41 = vector.load %arg10[%c0_30, %c0_31] : memref<128x64xf32, #tpu.memory_space<vmem>>, vector<128x64xf32>
    tpu.vector_store %arg10[%c0_30, %c0_31], %40 {strides = array<i32>} : memref<128x64xf32, #tpu.memory_space<vmem>>, vector<128x64xf32>,
    %c7_i32 = arith.constant 7 : i32
    %42 = arith.cmpi eq, %arg1, %c7_i32 : i32
    %43 = arith.extui %42 : i1 to i32
    %c0_i32_32 = arith.constant 0 : i32
    %44 = arith.cmpi ne, %43, %c0_i32_32 : i32
    scf.if %44 {
      %c0_33 = arith.constant 0 : index
      %c0_34 = arith.constant 0 : index
      %45 = vector.load %arg10[%c0_33, %c0_34] : memref<128x64xf32, #tpu.memory_space<vmem>>, vector<128x64xf32>
      %c0_35 = arith.constant 0 : index
      %c0_36 = arith.constant 0 : index
      %46 = vector.load %arg7[%c0_35, %c0_36] : memref<1x64xf32, #tpu.memory_space<vmem>>, vector<1x64xf32>
      %47 = vector.broadcast %46 : vector<1x64xf32> to vector<128x64xf32>
      %48 = arith.addf %45, %47 : vector<128x64xf32>
      %c0_37 = arith.constant 0 : index
      %c0_38 = arith.constant 0 : index
      %c0_39 = arith.constant 0 : index
      %49 = vector.load %arg8[%c0_37, %c0_38, %c0_39] : memref<1x128x64xf32, #tpu.memory_space<vmem>>, vector<1x128x64xf32>
      %50 = vector.shape_cast %49 : vector<1x128x64xf32> to vector<128x64xf32>
      %51 = vector.shape_cast %48 : vector<128x64xf32> to vector<1x128x64xf32>
      tpu.vector_store %arg8[%c0_37, %c0_38, %c0_39], %51 {strides = array<i32>} : memref<1x128x64xf32, #tpu.memory_space<vmem>>, vector<1x128x64xf32>,
    } else {
    }
    return
  }
  func.func @transform_0(%arg0: i32, %arg1: i32) -> (i32, i32, i32) {
    %c0_i32 = arith.constant 0 : i32
    %c0_i32_0 = arith.constant 0 : i32
    %c0_i32_1 = arith.constant 0 : i32
    return %arg0, %c0_i32, %c0_i32_0 : i32, i32, i32
  }
  func.func @transform_1(%arg0: i32, %arg1: i32) -> (i32, i32, i32) {
    %c0_i32 = arith.constant 0 : i32
    %c0_i32_0 = arith.constant 0 : i32
    %c0_i32_1 = arith.constant 0 : i32
    return %arg1, %c0_i32, %c0_i32_0 : i32, i32, i32
  }
  func.func @transform_2(%arg0: i32, %arg1: i32) -> (i32, i32, i32) {
    %c0_i32 = arith.constant 0 : i32
    %c0_i32_0 = arith.constant 0 : i32
    %c0_i32_1 = arith.constant 0 : i32
    return %arg1, %c0_i32, %c0_i32_0 : i32, i32, i32
  }
  func.func @transform_3(%arg0: i32, %arg1: i32) -> (i32, i32, i32) {
    %c0_i32 = arith.constant 0 : i32
    %c0_i32_0 = arith.constant 0 : i32
    %c0_i32_1 = arith.constant 0 : i32
    return %arg1, %c0_i32, %c0_i32_0 : i32, i32, i32
  }
  func.func @transform_4(%arg0: i32, %arg1: i32) -> (i32, i32, i32) {
    %c0_i32 = arith.constant 0 : i32
    %c0_i32_0 = arith.constant 0 : i32
    %c0_i32_1 = arith.constant 0 : i32
    return %arg1, %c0_i32, %c0_i32_0 : i32, i32, i32
  }
  func.func @transform_5(%arg0: i32, %arg1: i32) -> (i32, i32) {
    %c0_i32 = arith.constant 0 : i32
    %c0_i32_0 = arith.constant 0 : i32
    %c0_i32_1 = arith.constant 0 : i32
    return %c0_i32, %c0_i32_0 : i32, i32
  }
  func.func @transform_6(%arg0: i32, %arg1: i32) -> (i32, i32, i32) {
    %c0_i32 = arith.constant 0 : i32
    %c0_i32_0 = arith.constant 0 : i32
    %c0_i32_1 = arith.constant 0 : i32
    return %arg0, %c0_i32, %c0_i32_0 : i32, i32, i32
  }
  func.func @transform_7(%arg0: i32, %arg1: i32) -> (i32, i32, i32, i32) {
    %c0_i32 = arith.constant 0 : i32
    %c0_i32_0 = arith.constant 0 : i32
    %c0_i32_1 = arith.constant 0 : i32
    return %arg0, %arg1, %c0_i32, %c0_i32_0 : i32, i32, i32, i32
  }
}

</mosaic_0001>

<bundles_post_ra>
// kernel: tpu_custom_call.1
= control target key start
LH: loop header
LB: loop body
LE: loop exit
PB: predicated region body
PF: predicated region fallthrough
CT: control target
= control target key end

     0   :  { %s3591_s0 = inlined_call_operand.vmem [shape: f32[2,128,64], index: 0, kind: input, shape index: {}]   ;;  %s3592_s1 = inlined_call_operand.vmem [shape: f32[8,64,8], index: 1, kind: input, shape index: {}]   ;;  %s3593_s2 = inlined_call_operand.vmem [shape: f32[8,64,8], index: 2, kind: input, shape index: {}]   ;;  %s3594_s3 = inlined_call_operand.vmem [shape: f32[8,64,8], index: 3, kind: input, shape index: {}]   ;;  %s3595_s4 = inlined_call_operand.vmem [shape: f32[8,8,64], index: 4, kind: input, shape index: {}]   ;;  %s3596_s5 = inlined_call_operand.vmem [shape: f32[1,64], index: 5, kind: input, shape index: {}]   ;;  %s3597_s6 = inlined_call_operand.vmem [shape: f32[2,128,64], index: 6, kind: output, shape index: {0}]   ;;  %s3598_s7 = inlined_call_operand.hbm [shape: f32[2,8,128,128], index: 7, kind: output, shape index: {1}]  }
   0x1   :  { %3607 = sst [smem:[#allocation14_spill]] %s3591_s0 }
   0x2   :  { %3608 = sst [smem:[#allocation15_spill]] %s3592_s1 }
   0x3   :  { %13 = vsyncpa [#allocation4], 0 }
   0x4   :  { %15 = vsyncpa [#allocation4 + $0x1], 0  ;;  %s2934_s24 = smov 0   ;;  %s2936_s25 = smov 0  }
   0x5   :  { %s2938_s26 = smov 0   ;;  %s2940_s27 = smov 0  }
   0x6   :  { %s2942_s28 = smov 0   ;;  %s2944_s29 = smov 0  }
   0x7   :  { %s2946_s30 = smov 0   ;;  %s2948_s8 = smov 0  }
   0x8 LB: > { %3609 = sst [smem:[#allocation6_spill]] %s2860_s24  ;;  %s1982_s9 = sadd.s32 4294967295, %s2888_s8   ;;  %s2888_s8 = sphi %s2948_s8, %s21_s8   ;;  %s2884_s30 = sphi %s2946_s30, %s3631_s30   ;;  %s2880_s29 = sphi %s2944_s29, %s3630_s29   ;;  %s2876_s28 = sphi %s2942_s28, %s3629_s28   ;;  %s2872_s27 = sphi %s2940_s27, %s3628_s27   ;;  %s2868_s26 = sphi %s2938_s26, %s3627_s26   ;;  %s2864_s25 = sphi %s2936_s25, %s3633_s25   ;;  %s2860_s24 = sphi %s2934_s24, %s3632_s24  }
   0x9   : > { %3610 = sst [smem:[#allocation7_spill]] %s2868_s26  ;;  %s1983_s10 = sadd.s32 4294967294, %s2888_s8  }
   0xa   : > { %3611 = sst [smem:[#allocation8_spill]] %s2880_s29  ;;  %s30_s11 = sadd.s32 1, %s2880_s29 }
   0xb   : > { %3612 = sst [smem:[#allocation9_spill]] %s2884_s30  ;;  %p31_p0 = scmp.ge.s32.totalorder %s30_s11, 8 }
   0xc   : > { %s33_s12 = sadd.s32 1, %s2884_s30  ;;  %p229_p1 = scmp.ne.s32.totalorder %s2868_s26, %s2864_s25 }
   0xd   : > { %p230_p2 = scmp.eq.s32.totalorder %s1982_s9, 15  ;;  %s3635_s11 = smov (%p31_p0, %s30_s11), 0 }
   0xe   : > { %3613 = sst [smem:[#allocation10_spill]] %s3635_s11  ;;  %s3637_s12 = smov (!%p31_p0, %s33_s12), %s2884_s30 }
   0xf   : > { %s215_s13 = ssub.s32 %s2880_s29, %s3635_s11  ;;  %p2985_p3 = por %p230_p2, %p229_p1 }
  0x10   : > { %p35_p4 = scmp.ge.s32.totalorder %s3637_s12, 2  ;;  %p235_p5 = scmp.ne.s32.totalorder %s2864_s25, %s2860_s24 }
  0x11   : > { %p236_p6 = scmp.eq.s32.totalorder %s1983_s10, 15  ;;  %p1986_p7 = scmp.ge.s32.totalorder %s2888_s8, 1 }
  0x12   : > { %s3639_s12 = smov (%p35_p4, %s3637_s12), 0  ;;  %p296_p9 = scmp.lt.s32.totalorder %s2888_s8, 17 }
  0x13   : > { %3615 = sst [smem:[#allocation11_spill]] %s3639_s12  ;;  %p2994_p8 = por %p236_p6, %p235_p5 }
  0x14   : > { %s214_s16 = ssub.s32 %s2884_s30, %s3639_s12  ;;  %s219_s17 = sadd.s32 1, %s2868_s26 }
  0x15   : > { %s3616_s15 = scalar_select %p2994_p8, 1, 0 }
  0x16   : > { %s216_s18 = sor.u32 %s215_s13, %s214_s16  ;;  %p297_p10 = pnand %p1986_p7, %p296_p9 }
  0x17   : > { %3617 = sst [smem:[#allocation12_spill]] %s3616_s15  ;;  %p217_p11 = scmp.eq.s32.totalorder %s216_s18, 0 }
  0x18   : > { %300 = sbr.rel (%p297_p10) target bundleno = 1381 (0x565), region = 44  ;;  %s3603_s20 = sand.u32 (!%p297_p10), 1, %s2864_s25  }
  0x19   : > { %s3003_s19 = scalar_select %p217_p11, %s2868_s26, %s219_s17  }
  0x1a   : > { %p352_p12 = scmp.lt.s32.totalorder (!%p297_p10), %s2876_s28, 1  ;;  %s1987_s21 = sshll.u32 (!%p297_p10), %s3603_s20, 7 }
  0x1b   : > { %3618 = sst [smem:[#allocation13_spill]] %s3003_s19  ;;  %p357_p13 = scmp.lt.s32.totalorder (!%p297_p10), %s2872_s27, 7 }
  0x1c   : > { %s3619_s0 = sld [smem:[#allocation14_spill]] (!%p297_p10)  ;;  %s3620_s1 = sld [smem:[#allocation15_spill]] (!%p297_p10) }
  0x1d   : > { %p1999_p0 = scmp.ne.s32.totalorder (!%p297_p10), %s2872_s27, 0 }
  0x1f   : > { %s353_s22 = scalar_select %p352_p12, %s2876_s28, 1 }
  0x20   : > { %s358_s23 = scalar_select %p357_p13, %s2872_s27, 7 }
  0x21   : > { %s2104_s9 = sshll.u32 %s353_s22, 7  ;;  %384 = sbr.rel (%p1999_p0) target bundleno = 42 (0x2a), region = 48  ;;  %vm385_vm0 = vcmask (!%p1999_p0), 523264   ;;  %v2890_v0 = vmov (!%p1999_p0), 0.0  }
  0x22   : > { %s3015_s16 = scalar_lea.vmem %s3619_s0, %s2104_s9  ;;  %s2105_s17 = sshll.u32 %s358_s23, 6  ;;  %386 = vst.msk [vmem:[#allocation2] sm:$0xff] (!%p1999_p0), %vm385_vm0, %v2890_v0  ;;  %387 = vst.msk [vmem:[#allocation2 + $0x8] sm:$0xff] (!%p1999_p0), %vm385_vm0, %v2890_v0 }
  0x23   : > { %s3020_s11 = scalar_lea.vmem %s3620_s1, %s2105_s17  ;;  %s3025_s19 = scalar_lea.vmem %s3593_s2, %s2105_s17  ;;  %388 = vst.msk [vmem:[#allocation2 + $0x10] sm:$0xff] (!%p1999_p0), %vm385_vm0, %v2890_v0  ;;  %389 = vst.msk [vmem:[#allocation2 + $0x18] sm:$0xff] (!%p1999_p0), %vm385_vm0, %v2890_v0 }
  0x24   : > { %s3030_s22 = scalar_lea.vmem %s3594_s3, %s2105_s17  ;;  %s1996_s15 = sshll.u32 %s358_s23, 3  ;;  %390 = vst.msk [vmem:[#allocation2 + $0x20] sm:$0xff] (!%p1999_p0), %vm385_vm0, %v2890_v0  ;;  %391 = vst.msk [vmem:[#allocation2 + $0x28] sm:$0xff] (!%p1999_p0), %vm385_vm0, %v2890_v0 }
  0x25   : > { %s3035_s0 = scalar_lea.vmem %s3595_s4, %s1996_s15  ;;  %s3040_s18 = scalar_lea.vmem %s3597_s6, %s2104_s9  ;;  %392 = vst.msk [vmem:[#allocation2 + $0x30] sm:$0xff] (!%p1999_p0), %vm385_vm0, %v2890_v0  ;;  %393 = vst.msk [vmem:[#allocation2 + $0x38] sm:$0xff] (!%p1999_p0), %vm385_vm0, %v2890_v0 }
  0x26   : > { %s3042_s1 = scalar_lea.vmem [#allocation3], %s1987_s21  ;;  %394 = vst.msk [vmem:[#allocation2 + $0x40] sm:$0xff] (!%p1999_p0), %vm385_vm0, %v2890_v0  ;;  %395 = vst.msk [vmem:[#allocation2 + $0x48] sm:$0xff] (!%p1999_p0), %vm385_vm0, %v2890_v0 }
  0x27   : > { %396 = vst.msk [vmem:[#allocation2 + $0x50] sm:$0xff] (!%p1999_p0), %vm385_vm0, %v2890_v0  ;;  %397 = vst.msk [vmem:[#allocation2 + $0x58] sm:$0xff] (!%p1999_p0), %vm385_vm0, %v2890_v0 }
  0x28   : > { %398 = vst.msk [vmem:[#allocation2 + $0x60] sm:$0xff] %vm385_vm0, %v2890_v0  ;;  %399 = vst.msk [vmem:[#allocation2 + $0x68] sm:$0xff] %vm385_vm0, %v2890_v0 }
  0x29   : > { %400 = vst.msk [vmem:[#allocation2 + $0x70] sm:$0xff] %vm385_vm0, %v2890_v0  ;;  %401 = vst.msk [vmem:[#allocation2 + $0x78] sm:$0xff] %vm385_vm0, %v2890_v0 }
  0x2a PF: > { %v418_v1 = vld [vmem:[%s3020_s11] sm:$0xff]  ;;  %v419_v2 = vld [vmem:[%s3020_s11 + $0x8] sm:$0xff]  ;;  %v420_v3 = vld [vmem:[%s3020_s11 + $0x10] sm:$0xff]  ;;  %vm426_vm1 = vcmask 523264   ;;  %vm942_vm2 = vcmask 64512   ;;  %p2096_p1 = scmp.ne.s32.totalorder %s2872_s27, 7 }
  0x2b   : > { %v2520_v4 = vpack.c.bf16 %v419_v2, %v418_v1  ;;  %v421_v5 = vld [vmem:[%s3020_s11 + $0x18] sm:$0xff]  ;;  %v422_v7 = vld [vmem:[%s3020_s11 + $0x20] sm:$0xff]  ;;  %v423_v8 = vld [vmem:[%s3020_s11 + $0x28] sm:$0xff] }
  0x2c   : > { %v2524_v6 = vpack.c.bf16 %v421_v5, %v420_v3  ;;  %v3068_v9 = vld [vmem:[%s3015_s16 + $0x40] sm:$0xff]  ;;  %v2528_v10 = vpack.c.bf16 %v423_v8, %v422_v7  ;;  %v424_v11 = vld [vmem:[%s3020_s11 + $0x30] sm:$0xff]  ;;  %v425_v12 = vld [vmem:[%s3020_s11 + $0x38] sm:$0xff] }
  0x2d   : > { %2648 = vmatprep.subr.bf16.mxu1 %v2520_v4  ;;  %2290 = vmatprep.mubr.msk.f32.mxu1 %vm426_vm1, %v3068_v9  ;;  %v2532_v13 = vpack.c.bf16 %v425_v12, %v424_v11  ;;  %v402_v14 = vld [vmem:[%s3015_s16] sm:$0xff]  ;;  %v637_v16 = vld [vmem:[%s3025_s19 + $0x8] sm:$0xff]  ;;  %v638_v18 = vld [vmem:[%s3025_s19 + $0x10] sm:$0xff] }
  0x2e   : > { %2652 = vmatpush3.bf16.msra.mxu1 %v2520_v4  ;;  %2521 = vmatprep.subr.bf16.mxu0 %v2520_v4  ;;  %v636_v15 = vld [vmem:[%s3025_s19] sm:$0xff]  ;;  %v639_v19 = vld [vmem:[%s3025_s19 + $0x18] sm:$0xff]  ;;  %v3081_v20 = vld [vmem:[%s3015_s16 + $0x48] sm:$0xff] }
  0x2f   : > { %2649 = vmatprep.subr.bf16.mxu1 %v2524_v6  ;;  %2523 = vmatpush3.bf16.msra.mxu0 %v2520_v4  ;;  %v2536_v17 = vpack.c.bf16 %v637_v16, %v636_v15  ;;  %v3084_v21 = vld [vmem:[%s3015_s16 + $0x50] sm:$0xff]  ;;  %v2540_v22 = vpack.c.bf16 %v639_v19, %v638_v18  ;;  %v640_v23 = vld [vmem:[%s3025_s19 + $0x20] sm:$0xff]  ;;  %v641_v24 = vld [vmem:[%s3025_s19 + $0x28] sm:$0xff] }
  0x30   : > { %2525 = vmatprep.subr.bf16.mxu0 %v2524_v6  ;;  %2278 = vmatprep.mubr.msk.f32.mxu0 %vm426_vm1, %v402_v14  ;;  %v3093_v25 = vld [vmem:[%s3015_s16 + $0x58] sm:$0xff]  ;;  %v3096_v26 = vld [vmem:[%s3015_s16 + $0x8] sm:$0xff]  ;;  %v3099_v27 = vld [vmem:[%s3015_s16 + $0x60] sm:$0xff]  ;;  %v2544_v28 = vpack.c.bf16 %v641_v24, %v640_v23 }
  0x31   : > { %v3102_v29 = vld [vmem:[%s3015_s16 + $0x10] sm:$0xff]  ;;  %v643_v31 = vld [vmem:[%s3025_s19 + $0x38] sm:$0xff]  ;;  %v3115_v32 = vld [vmem:[%s3015_s16 + $0x68] sm:$0xff] }
  0x32   : > { %2653 = vmatpush3.bf16.msra.mxu1 %v2524_v6  ;;  %v642_v30 = vld [vmem:[%s3025_s19 + $0x30] sm:$0xff]  ;;  %v3118_v33 = vld [vmem:[%s3015_s16 + $0x18] sm:$0xff]  ;;  %v3124_v36 = vld [vmem:[%s3015_s16 + $0x20] sm:$0xff] }
  0x33   : > { %2650 = vmatprep.subr.bf16.mxu1 %v2528_v10  ;;  %2527 = vmatpush3.bf16.msra.mxu0 %v2524_v6  ;;  %v3121_v34 = vld [vmem:[%s3015_s16 + $0x70] sm:$0xff]  ;;  %v2548_v35 = vpack.c.bf16 %v643_v31, %v642_v30  ;;  %v3135_v37 = vld [vmem:[%s3015_s16 + $0x78] sm:$0xff]  ;;  %v3138_v38 = vld [vmem:[%s3015_s16 + $0x28] sm:$0xff] }
  0x34   : > { %2529 = vmatprep.subr.bf16.mxu0 %v2528_v10  ;;  %v3141_v39 = vld [vmem:[%s3015_s16 + $0x30] sm:$0xff]  ;;  %v3151_v40 = vld [vmem:[%s3015_s16 + $0x38] sm:$0xff]  ;;  %vm3205_vm3 = vmpackc.low %vm942_vm2, %vm942_vm2 }
  0x35   : > { %v796_v60 = vld [vmem:[%s3030_s22 + $0x38] sm:$0xff] }
  0x36   : > { %2654 = vmatpush3.bf16.msra.mxu1 %v2528_v10 }
  0x37   : > { %2651 = vmatprep.subr.bf16.mxu1 %v2532_v13  ;;  %2531 = vmatpush3.bf16.msra.mxu0 %v2528_v10 }
  0x38   : > { %2533 = vmatprep.subr.bf16.mxu0 %v2532_v13 }
  0x3a   : > { %2655 = vmatpush3.bf16.msra.mxu1 %v2532_v13 }
  0x3b   : > { %2537 = vmatprep.subr.bf16.mxu1 %v2536_v17  ;;  %2535 = vmatpush3.bf16.msra.mxu0 %v2532_v13 }
  0x3d   : > { %2291 = vmatmul.mubr.msk.f32.vlgmr.msra.gmra.mrb[0].mxu1 %vm426_vm1, %v3081_v20 }
  0x3e   : > { %2539 = vmatpush3.bf16.msra.mxu1 %v2536_v17  ;;  %2293 = vmatprep.mubr.msk.f32.mxu1 %vm426_vm1, %v3084_v21 }
  0x3f   : > { %2541 = vmatprep.subr.bf16.mxu1 %v2540_v22  ;;  %2279 = vmatmul.mubr.msk.f32.vlgmr.msra.gmra.mrb[0].mxu0 %vm426_vm1, %v3096_v26 }
  0x40   : > { %2281 = vmatprep.mubr.msk.f32.mxu0 %vm426_vm1, %v3102_v29 }
  0x41   : > { %2294 = vmatmul.mubr.msk.f32.gmra.mrb[2].mxu1 %vm426_vm1, %v3093_v25 }
  0x42   : > { %2543 = vmatpush3.bf16.msra.mxu1 %v2540_v22  ;;  %2296 = vmatprep.mubr.msk.f32.mxu1 %vm426_vm1, %v3099_v27 }
  0x43   : > { %2545 = vmatprep.subr.bf16.mxu1 %v2544_v28  ;;  %2282 = vmatmul.mubr.msk.f32.gmra.mrb[2].mxu0 %vm426_vm1, %v3118_v33 }
  0x44   : > { %2284 = vmatprep.mubr.msk.f32.mxu0 %vm426_vm1, %v3124_v36 }
  0x45   : > { %2297 = vmatmul.mubr.msk.f32.gmra.mrb[4].mxu1 %vm426_vm1, %v3115_v32 }
  0x46   : > { %2547 = vmatpush3.bf16.msra.mxu1 %v2544_v28  ;;  %2299 = vmatprep.mubr.msk.f32.mxu1 %vm426_vm1, %v3121_v34 }
  0x47   : > { %2549 = vmatprep.subr.bf16.mxu1 %v2548_v35  ;;  %2285 = vmatmul.mubr.msk.f32.gmra.mrb[4].mxu0 %vm426_vm1, %v3138_v38 }
  0x48   : > { %2287 = vmatprep.mubr.msk.f32.mxu0 %vm426_vm1, %v3141_v39 }
  0x49   : > { %2300 = vmatmul.mubr.msk.f32.gmra.mrb[6].mxu1 %vm426_vm1, %v3135_v37 }
  0x4a   : > { %2551 = vmatpush3.bf16.msra.mxu1 %v2548_v35  ;;  %2318 = vmatprep.mubr.msk.f32.mxu1 %vm426_vm1, %v402_v14 }
  0x4b   : > { %2288 = vmatmul.mubr.msk.f32.gmra.mrb[6].mxu0 %vm426_vm1, %v3151_v40 }
  0x4c   : > { %2358 = vmatprep.mubr.msk.f32.mxu0 %vm426_vm1, %v402_v14 }
  0x4d   : > { %2319 = vmatmul.mubr.msk.f32.vlgmr.msra.gmra.mrb[8].mxu1 %vm426_vm1, %v3096_v26 }
  0x4e   : > { %2321 = vmatprep.mubr.msk.f32.mxu1 %vm426_vm1, %v3102_v29 }
  0x51   : > { %2322 = vmatmul.mubr.msk.f32.gmra.mrb[10].mxu1 %vm426_vm1, %v3118_v33 }
  0x52   : > { %2324 = vmatprep.mubr.msk.f32.mxu1 %vm426_vm1, %v3124_v36 }
  0x55   : > { %2325 = vmatmul.mubr.msk.f32.gmra.mrb[12].mxu1 %vm426_vm1, %v3138_v38 }
  0x56   : > { %2327 = vmatprep.mubr.msk.f32.mxu1 %vm426_vm1, %v3141_v39 }
  0x59   : > { %2328 = vmatmul.mubr.msk.f32.gmra.mrb[14].mxu1 %vm426_vm1, %v3151_v40 }
  0x5a   : > { %2330 = vmatprep.mubr.msk.f32.mxu1 %vm426_vm1, %v3068_v9 }
  0x5d   : > { %2331 = vmatmul.mubr.msk.f32.gmra.mrb[16].mxu1 %vm426_vm1, %v3081_v20 }
  0x5e   : > { %2333 = vmatprep.mubr.msk.f32.mxu1 %vm426_vm1, %v3084_v21 }
  0x61   : > { %2334 = vmatmul.mubr.msk.f32.gmra.mrb[18].mxu1 %vm426_vm1, %v3093_v25 }
  0x62   : > { %2336 = vmatprep.mubr.msk.f32.mxu1 %vm426_vm1, %v3099_v27 }
  0x65   : > { %2337 = vmatmul.mubr.msk.f32.gmra.mrb[20].mxu1 %vm426_vm1, %v3115_v32 }
  0x66   : > { %2339 = vmatprep.mubr.msk.f32.mxu1 %vm426_vm1, %v3121_v34 }
  0x69   : > { %2340 = vmatmul.mubr.msk.f32.gmra.mrb[22].mxu1 %vm426_vm1, %v3135_v37 }
 0x110   : > { %v3186_v41 = vpop.f32.mrb[0].mxu1 }
 0x111   : > { %v3188_v42 = vpop.f32.mrb[1].mxu1 }
 0x112   : > { %v2280_v43 = vpop.f32.mrb[0].mxu0 }
 0x113   : > { %v541_v44 = vpop.f32.mrb[1].mxu0  ;;  %v621_v23 = vmul.f32 0.35355338, %v2280_v43  ;;  %v629_v43 = vmul.f32 0.35355338, %v3186_v41 }
 0x114   : > { %v3190_v45 = vpop.f32.mrb[2].mxu1  ;;  %v620_v46 = vmul.f32 0.35355338, %v541_v44  ;;  %v628_v44 = vmul.f32 0.35355338, %v3188_v42 }
 0x115   : > { %v3192_v47 = vpop.f32.mrb[3].mxu1 }
 0x116   : > { %v2283_v48 = vpop.f32.mrb[2].mxu0  ;;  %2414 = vmatprep.mubr.msk.f32.mxu1 %vm942_vm2, %v620_v46  ;;  %v630_v46 = vmul.f32 0.35355338, %v3192_v47  ;;  %v789_v47 = vld [vmem:[%s3030_s22] sm:$0xff] }
 0x117   : > { %v551_v49 = vpop.f32.mrb[3].mxu0  ;;  %v623_v28 = vmul.f32 0.35355338, %v2283_v48  ;;  %v631_v48 = vmul.f32 0.35355338, %v3190_v45 }
 0x118   : > { %v3195_v50 = vpop.f32.mrb[4].mxu1  ;;  %v622_v22 = vmul.f32 0.35355338, %v551_v49 }
 0x119   : > { %v3197_v51 = vpop.f32.mrb[5].mxu1  ;;  %v633_v41 = vmul.f32 0.35355338, %v3195_v50  ;;  %v794_v50 = vld [vmem:[%s3030_s22 + $0x28] sm:$0xff] }
 0x11a   : > { %v2286_v52 = vpop.f32.mrb[4].mxu0  ;;  %v632_v42 = vmul.f32 0.35355338, %v3197_v51  ;;  %v790_v51 = vld [vmem:[%s3030_s22 + $0x8] sm:$0xff] }
 0x11b   : > { %v561_v53 = vpop.f32.mrb[5].mxu0  ;;  %v625_v30 = vmul.f32 0.35355338, %v2286_v52  ;;  %v791_v52 = vld [vmem:[%s3030_s22 + $0x10] sm:$0xff] }
 0x11c   : > { %v3199_v54 = vpop.f32.mrb[6].mxu1  ;;  %v624_v24 = vmul.f32 0.35355338, %v561_v53  ;;  %v2552_v53 = vpack.c.bf16 %v790_v51, %v789_v47 }
 0x11d   : > { %v3201_v55 = vpop.f32.mrb[7].mxu1  ;;  %v635_v45 = vmul.f32 0.35355338, %v3199_v54 }
 0x11e   : > { %v2289_v56 = vpop.f32.mrb[6].mxu0  ;;  %v634_v49 = vmul.f32 0.35355338, %v3201_v55  ;;  %2553 = vmatprep.subr.bf16.mxu0 %v2552_v53 }
 0x11f   : > { %v571_v57 = vpop.f32.mrb[7].mxu0  ;;  %v627_v35 = vmul.f32 0.35355338, %v2289_v56  ;;  %v792_v56 = vld [vmem:[%s3030_s22 + $0x18] sm:$0xff]  ;;  %2555 = vmatpush3.bf16.msra.mxu0 %v2552_v53 }
 0x120   : > { %v2320_v58 = vpop.f32.mrb[8].mxu1  ;;  %v626_v31 = vmul.f32 0.35355338, %v571_v57  ;;  %v2556_v57 = vpack.c.bf16 %v792_v56, %v791_v52 }
 0x121   : > { %v710_v59 = vpop.f32.mrb[9].mxu1 }
 0x122   : > { %v2568_v61 = vpack.c.bf16 %v2320_v58, %v710_v59  ;;  %v793_v58 = vld [vmem:[%s3030_s22 + $0x20] sm:$0xff]  ;;  %2557 = vmatprep.subr.bf16.mxu0 %v2556_v57  ;;  %v795_v59 = vld [vmem:[%s3030_s22 + $0x30] sm:$0xff] }
 0x123   : > { %v2560_v55 = vpack.c.bf16 %v794_v50, %v793_v58  ;;  %2559 = vmatpush3.bf16.msra.mxu0 %v2556_v57 }
 0x124   : > { %2570 = vmatprep.subr.msk.bf16.mxu1 %vm3205_vm3, %v2568_v61  ;;  %v2323_v62 = vpop.f32.mrb[10].mxu1 }
 0x125   : > { %2573 = vmatpush3.bf16.xpose.msk.msra.mxu1 %vm3205_vm3, %v2568_v61  ;;  %v720_v63 = vpop.f32.mrb[11].mxu1  ;;  %2561 = vmatprep.subr.bf16.mxu0 %v2560_v55  ;;  %v2564_v61 = vpack.c.bf16 %v796_v60, %v795_v59 }
 0x126   : > { %v2574_v0 = vpack.c.bf16 %v2323_v62, %v720_v63 }
 0x127   : > { %2563 = vmatpush3.bf16.msra.mxu0 %v2560_v55 }
 0x128   : > { %2576 = vmatprep.subr.msk.bf16.mxu1 %vm3205_vm3, %v2574_v0  ;;  %v2326_v1 = vpop.f32.mrb[12].mxu1  ;;  %2565 = vmatprep.subr.bf16.mxu0 %v2564_v61 }
 0x129   : > { %v730_v2 = vpop.f32.mrb[13].mxu1 }
 0x12a   : > { %v2580_v3 = vpack.c.bf16 %v2326_v1, %v730_v2 }
 0x12b   : > { %2567 = vmatpush3.bf16.msra.mxu0 %v2564_v61 }
 0x12c   : > { %v2329_v4 = vpop.f32.mrb[14].mxu1 }
 0x12d   : > { %2579 = vmatpush3.bf16.xpose.msk.msra.mxu1 %vm3205_vm3, %v2574_v0  ;;  %v740_v5 = vpop.f32.mrb[15].mxu1 }
 0x12e   : > { %2582 = vmatprep.subr.msk.bf16.mxu1 %vm3205_vm3, %v2580_v3  ;;  %v2586_v6 = vpack.c.bf16 %v2329_v4, %v740_v5  ;;  %2359 = vmatmul.mubr.msk.f32.vlgmr.msra.gmra.mrb[8].mxu0 %vm426_vm1, %v3096_v26 }
 0x12f   : > { %2361 = vmatprep.mubr.msk.f32.mxu0 %vm426_vm1, %v3102_v29 }
 0x130   : > { %v2332_v7 = vpop.f32.mrb[16].mxu1 }
 0x131   : > { %v750_v8 = vpop.f32.mrb[17].mxu1 }
 0x132   : > { %v2592_v10 = vpack.c.bf16 %v2332_v7, %v750_v8  ;;  %2362 = vmatmul.mubr.msk.f32.gmra.mrb[10].mxu0 %vm426_vm1, %v3118_v33 }
 0x133   : > { %2364 = vmatprep.mubr.msk.f32.mxu0 %vm426_vm1, %v3124_v36 }
 0x134   : > { %v2335_v11 = vpop.f32.mrb[18].mxu1 }
 0x135   : > { %2585 = vmatpush3.bf16.xpose.msk.msra.mxu1 %vm3205_vm3, %v2580_v3  ;;  %v760_v12 = vpop.f32.mrb[19].mxu1 }
 0x136   : > { %2588 = vmatprep.subr.msk.bf16.mxu1 %vm3205_vm3, %v2586_v6  ;;  %v2598_v13 = vpack.c.bf16 %v2335_v11, %v760_v12  ;;  %2365 = vmatmul.mubr.msk.f32.gmra.mrb[12].mxu0 %vm426_vm1, %v3138_v38 }
 0x137   : > { %2367 = vmatprep.mubr.msk.f32.mxu0 %vm426_vm1, %v3141_v39 }
 0x138   : > { %v2338_v14 = vpop.f32.mrb[20].mxu1 }
 0x139   : > { %v770_v15 = vpop.f32.mrb[21].mxu1 }
 0x13a   : > { %v2604_v16 = vpack.c.bf16 %v2338_v14, %v770_v15  ;;  %2368 = vmatmul.mubr.msk.f32.gmra.mrb[14].mxu0 %vm426_vm1, %v3151_v40 }
 0x13b   : > { %2370 = vmatprep.mubr.msk.f32.mxu0 %vm426_vm1, %v3068_v9  ;;  %v1184_v9 = vlaneseq }
 0x13c   : > { %v2341_v17 = vpop.f32.mrb[22].mxu1 }
 0x13d   : > { %2591 = vmatpush3.bf16.xpose.msk.msra.mxu1 %vm3205_vm3, %v2586_v6  ;;  %v780_v18 = vpop.f32.mrb[23].mxu1 }
 0x13e   : > { %2594 = vmatprep.subr.msk.bf16.mxu1 %vm3205_vm3, %v2592_v10  ;;  %v2610_v19 = vpack.c.bf16 %v2341_v17, %v780_v18  ;;  %2371 = vmatmul.mubr.msk.f32.gmra.mrb[16].mxu0 %vm426_vm1, %v3081_v20  ;;  %v1185_v20 = vand.u32 127, %v1184_v9 }
 0x13f   : > { %2373 = vmatprep.mubr.msk.f32.mxu0 %vm426_vm1, %v3084_v21 }
 0x140   : > { %vm1186_vm4 = vcmp.lt.s32.totalorder %v1185_v20, 8 }
 0x142   : > { %2374 = vmatmul.mubr.msk.f32.gmra.mrb[18].mxu0 %vm426_vm1, %v3093_v25 }
 0x143   : > { %2376 = vmatprep.mubr.msk.f32.mxu0 %vm426_vm1, %v3099_v27 }
 0x145   : > { %2597 = vmatpush3.bf16.xpose.msk.msra.mxu1 %vm3205_vm3, %v2592_v10 }
 0x146   : > { %2600 = vmatprep.subr.msk.bf16.mxu1 %vm3205_vm3, %v2598_v13  ;;  %2377 = vmatmul.mubr.msk.f32.gmra.mrb[20].mxu0 %vm426_vm1, %v3115_v32 }
 0x147   : > { %2379 = vmatprep.mubr.msk.f32.mxu0 %vm426_vm1, %v3121_v34 }
 0x14a   : > { %2380 = vmatmul.mubr.msk.f32.gmra.mrb[22].mxu0 %vm426_vm1, %v3135_v37 }
 0x14d   : > { %2603 = vmatpush3.bf16.xpose.msk.msra.mxu1 %vm3205_vm3, %v2598_v13 }
 0x14e   : > { %2606 = vmatprep.subr.msk.bf16.mxu1 %vm3205_vm3, %v2604_v16 }
 0x155   : > { %2609 = vmatpush3.bf16.xpose.msk.msra.mxu1 %vm3205_vm3, %v2604_v16 }
 0x156   : > { %2612 = vmatprep.subr.msk.bf16.mxu1 %vm3205_vm3, %v2610_v19 }
 0x15d   : > { %2615 = vmatpush3.bf16.xpose.msk.msra.mxu1 %vm3205_vm3, %v2610_v19 }
 0x164   : > { %2415 = vmatmul.mubr.msk.f32.vlgmr.msra.gmra.mrb[24].mxu1 %vm942_vm2, %v621_v23 }
 0x165   : > { %2417 = vmatprep.mubr.msk.f32.mxu1 %vm942_vm2, %v622_v22 }
 0x168   : > { %2418 = vmatmul.mubr.msk.f32.gmra.mrb[26].mxu1 %vm942_vm2, %v623_v28 }
 0x169   : > { %2420 = vmatprep.mubr.msk.f32.mxu1 %vm942_vm2, %v624_v24 }
 0x16c   : > { %2421 = vmatmul.mubr.msk.f32.gmra.mrb[28].mxu1 %vm942_vm2, %v625_v30 }
 0x16d   : > { %2423 = vmatprep.mubr.msk.f32.mxu1 %vm942_vm2, %v626_v31 }
 0x170   : > { %2424 = vmatmul.mubr.msk.f32.gmra.mrb[30].mxu1 %vm942_vm2, %v627_v35 }
 0x171   : > { %2426 = vmatprep.mubr.msk.f32.mxu1 %vm942_vm2, %v628_v44 }
 0x174   : > { %2427 = vmatmul.mubr.msk.f32.gmra.mrb[32].mxu1 %vm942_vm2, %v629_v43 }
 0x175   : > { %2429 = vmatprep.mubr.msk.f32.mxu1 %vm942_vm2, %v630_v46 }
 0x178   : > { %2430 = vmatmul.mubr.msk.f32.gmra.mrb[34].mxu1 %vm942_vm2, %v631_v48 }
 0x179   : > { %2432 = vmatprep.mubr.msk.f32.mxu1 %vm942_vm2, %v632_v42 }
 0x17c   : > { %2433 = vmatmul.mubr.msk.f32.gmra.mrb[36].mxu1 %vm942_vm2, %v633_v41 }
 0x17d   : > { %2435 = vmatprep.mubr.msk.f32.mxu1 %vm942_vm2, %v634_v49 }
 0x180   : > { %2436 = vmatmul.mubr.msk.f32.gmra.mrb[38].mxu1 %vm942_vm2, %v635_v45 }
 0x201   : > { %v2360_v17 = vpop.f32.mrb[8].mxu0 }
 0x202   : > { %v863_v18 = vpop.f32.mrb[9].mxu0 }
 0x203   : > { %v2616_v19 = vpack.c.bf16 %v2360_v17, %v863_v18 }
 0x205   : > { %v2363_v22 = vpop.f32.mrb[10].mxu0  ;;  %2617 = vmatprep.subr.bf16.mxu0 %v2616_v19 }
 0x206   : > { %v873_v23 = vpop.f32.mrb[11].mxu0  ;;  %2619 = vmatpush3.bf16.msra.mxu0 %v2616_v19 }
 0x207   : > { %v2620_v24 = vpack.c.bf16 %v2363_v22, %v873_v23 }
 0x209   : > { %v2366_v31 = vpop.f32.mrb[12].mxu0  ;;  %2621 = vmatprep.subr.bf16.mxu0 %v2620_v24 }
 0x20a   : > { %v883_v35 = vpop.f32.mrb[13].mxu0  ;;  %2623 = vmatpush3.bf16.msra.mxu0 %v2620_v24 }
 0x20b   : > { %v2624_v43 = vpack.c.bf16 %v2366_v31, %v883_v35 }
 0x20d   : > { %v2369_v49 = vpop.f32.mrb[14].mxu0  ;;  %2625 = vmatprep.subr.bf16.mxu0 %v2624_v43 }
 0x20e   : > { %v893_v45 = vpop.f32.mrb[15].mxu0  ;;  %2627 = vmatpush3.bf16.msra.mxu0 %v2624_v43 }
 0x20f   : > { %v2628_v52 = vpack.c.bf16 %v2369_v49, %v893_v45 }
 0x211   : > { %v2372_v50 = vpop.f32.mrb[16].mxu0  ;;  %2629 = vmatprep.subr.bf16.mxu0 %v2628_v52 }
 0x212   : > { %v903_v55 = vpop.f32.mrb[17].mxu0  ;;  %2631 = vmatpush3.bf16.msra.mxu0 %v2628_v52 }
 0x213   : > { %v2632_v61 = vpack.c.bf16 %v2372_v50, %v903_v55 }
 0x215   : > { %2633 = vmatprep.subr.bf16.mxu0 %v2632_v61 }
 0x216   : > { %2635 = vmatpush3.bf16.msra.mxu0 %v2632_v61 }
 0x237   : > { %v2416_v26 = vpop.f32.mrb[24].mxu1 }
 0x238   : > { %v1105_v21 = vpop.f32.mrb[25].mxu1  ;;  %v3304_v27 = vsel %vm1186_vm4, %v2416_v26, -1e+30 }
 0x239   : > { %v1187_v29 = vsel %vm1186_vm4, %v1105_v21, -1e+30 }
 0x23a   : > { %1203 = vmax.xlane.f32.xlu0 %v1187_v29 }
 0x23b   : > { %v2419_v25 = vpop.f32.mrb[26].mxu1 }
 0x23c   : > { %v1115_v33 = vpop.f32.mrb[27].mxu1  ;;  %v3312_v37 = vsel %vm1186_vm4, %v2419_v25, -1e+30 }
 0x23d   : > { %v3307_v32 = vsel %vm1186_vm4, %v1115_v33, -1e+30 }
 0x23e   : > { %1205 = vmax.xlane.f32.xlu0 %v3304_v27  ;;  %1207 = vmax.xlane.f32.xlu1 %v3307_v32 }
 0x23f   : > { %v2422_v34 = vpop.f32.mrb[28].mxu1 }
 0x240   : > { %v1125_v36 = vpop.f32.mrb[29].mxu1  ;;  %v3320_v54 = vsel %vm1186_vm4, %v2422_v34, -1e+30 }
 0x241   : > { %v3315_v38 = vsel %vm1186_vm4, %v1125_v36, -1e+30 }
 0x242   : > { %1209 = vmax.xlane.f32.xlu1 %v3312_v37  ;;  %1211 = vmax.xlane.f32.xlu0 %v3315_v38 }
 0x243   : > { %v2425_v39 = vpop.f32.mrb[30].mxu1 }
 0x244   : > { %v1135_v40 = vpop.f32.mrb[31].mxu1  ;;  %v3328_v1 = vsel %vm1186_vm4, %v2425_v39, -1e+30 }
 0x245   : > { %v3323_v62 = vsel %vm1186_vm4, %v1135_v40, -1e+30 }
 0x246   : > { %1213 = vmax.xlane.f32.xlu1 %v3320_v54  ;;  %1215 = vmax.xlane.f32.xlu0 %v3323_v62 }
 0x247   : > { %v2428_v63 = vpop.f32.mrb[32].mxu1 }
 0x248   : > { %v1145_v0 = vpop.f32.mrb[33].mxu1  ;;  %v3336_v5 = vsel %vm1186_vm4, %v2428_v63, -1e+30 }
 0x249   : > { %v3331_v2 = vsel %vm1186_vm4, %v1145_v0, -1e+30 }
 0x24a   : > { %1217 = vmax.xlane.f32.xlu1 %v3328_v1  ;;  %1219 = vmax.xlane.f32.xlu0 %v3331_v2 }
 0x24b   : > { %v2431_v3 = vpop.f32.mrb[34].mxu1 }
 0x24c   : > { %v1155_v4 = vpop.f32.mrb[35].mxu1  ;;  %v3344_v10 = vsel %vm1186_vm4, %v2431_v3, -1e+30 }
 0x24d   : > { %v3339_v6 = vsel %vm1186_vm4, %v1155_v4, -1e+30 }
 0x24e   : > { %1221 = vmax.xlane.f32.xlu1 %v3336_v5  ;;  %1223 = vmax.xlane.f32.xlu0 %v3339_v6 }
 0x24f   : > { %v2434_v7 = vpop.f32.mrb[36].mxu1 }
 0x250   : > { %v1165_v8 = vpop.f32.mrb[37].mxu1  ;;  %v3352_v14 = vsel %vm1186_vm4, %v2434_v7, -1e+30 }
 0x251   : > { %v3347_v11 = vsel %vm1186_vm4, %v1165_v8, -1e+30 }
 0x252   : > { %1225 = vmax.xlane.f32.xlu1 %v3344_v10  ;;  %1227 = vmax.xlane.f32.xlu0 %v3347_v11 }
 0x253   : > { %v2437_v12 = vpop.f32.mrb[38].mxu1 }
 0x254   : > { %v1175_v13 = vpop.f32.mrb[39].mxu1  ;;  %v3360_v16 = vsel %vm1186_vm4, %v2437_v12, -1e+30 }
 0x255   : > { %v3355_v15 = vsel %vm1186_vm4, %v1175_v13, -1e+30 }
 0x256   : > { %1229 = vmax.xlane.f32.xlu1 %v3352_v14  ;;  %1231 = vmax.xlane.f32.xlu0 %v3355_v15 }
 0x25a   : > { %1233 = vmax.xlane.f32.xlu1 %v3360_v16 }
 0x2c7   : > { %v1204_v28 = vpop.xlane.xlu0 %1203 }
 0x2c8   : > { %v1235_v30 = vsub.f32 %v1187_v29, %v1204_v28  ;;  %v2375_v29 = vpop.f32.mrb[18].mxu0 }
 0x2ca   : > { %v1251_v44 = vmul.f32 1.442695, %v1235_v30 }
 0x2cb   : > { %v1206_v46 = vpop.xlane.xlu0 %1205  ;;  %v1208_v48 = vpop.xlane.xlu1 %1207 }
 0x2cc   : > { %2730 = vpow2.f32 %v1251_v44  ;;  %v1236_v42 = vsub.f32 %v3304_v27, %v1206_v46  ;;  %v1237_v41 = vsub.f32 %v3307_v32, %v1208_v48 }
 0x2ce   : > { %v1253_v47 = vmul.f32 1.442695, %v1236_v42  ;;  %v1255_v51 = vmul.f32 1.442695, %v1237_v41 }
 0x2cf   : > { %v1210_v53 = vpop.xlane.xlu1 %1209  ;;  %v1212_v56 = vpop.xlane.xlu0 %1211 }
 0x2d0   : > { %2732 = vpow2.f32 %v1253_v47  ;;  %v1238_v57 = vsub.f32 %v3312_v37, %v1210_v53  ;;  %v1239_v58 = vsub.f32 %v3315_v38, %v1212_v56 }
 0x2d1   : > { %2734 = vpow2.f32 %v1255_v51 }
 0x2d2   : > { %v1257_v59 = vmul.f32 1.442695, %v1238_v57  ;;  %v1259_v60 = vmul.f32 1.442695, %v1239_v58  ;;  %v1524_v58 = vld [vmem:[%s3035_s0] sm:$0xff] }
 0x2d3   : > { %v1214_v9 = vpop.xlane.xlu1 %1213  ;;  %v1216_v20 = vpop.xlane.xlu0 %1215 }
 0x2d4   : > { %2736 = vpow2.f32 %v1257_v59  ;;  %v1240_v26 = vsub.f32 %v3320_v54, %v1214_v9  ;;  %v1241_v21 = vsub.f32 %v3323_v62, %v1216_v20 }
 0x2d5   : > { %2738 = vpow2.f32 %v1259_v60 }
 0x2d6   : > { %v3369_v25 = vpop.eup %2730  ;;  %v1261_v33 = vmul.f32 1.442695, %v1240_v26  ;;  %v1263_v27 = vmul.f32 1.442695, %v1241_v21 }
 0x2d7   : > { %v1218_v32 = vpop.xlane.xlu1 %1217  ;;  %v1220_v34 = vpop.xlane.xlu0 %1219  ;;  %1283 = vadd.xlane.f32.xlu0 %v3369_v25 }
 0x2d8   : > { %2740 = vpow2.f32 %v1261_v33  ;;  %v1242_v36 = vsub.f32 %v3328_v1, %v1218_v32  ;;  %v1243_v37 = vsub.f32 %v3331_v2, %v1220_v34 }
 0x2d9   : > { %2742 = vpow2.f32 %v1263_v27 }
 0x2da   : > { %v3374_v38 = vpop.eup %2732  ;;  %v1265_v39 = vmul.f32 1.442695, %v1242_v36  ;;  %v1267_v40 = vmul.f32 1.442695, %v1243_v37 }
 0x2db   : > { %v3376_v54 = vpop.eup %2734  ;;  %v1222_v62 = vpop.xlane.xlu1 %1221  ;;  %1285 = vadd.xlane.f32.xlu1 %v3374_v38 }
 0x2dc   : > { %v1224_v63 = vpop.xlane.xlu0 %1223  ;;  %2744 = vpow2.f32 %v1265_v39  ;;  %v1244_v0 = vsub.f32 %v3336_v5, %v1222_v62  ;;  %1287 = vadd.xlane.f32.xlu0 %v3376_v54 }
 0x2dd   : > { %v1245_v3 = vsub.f32 %v3339_v6, %v1224_v63  ;;  %2746 = vpow2.f32 %v1267_v40 }
 0x2de   : > { %v3382_v1 = vpop.eup %2736  ;;  %v1269_v2 = vmul.f32 1.442695, %v1244_v0 }
 0x2df   : > { %v1271_v4 = vmul.f32 1.442695, %v1245_v3  ;;  %v3384_v7 = vpop.eup %2738  ;;  %v1226_v8 = vpop.xlane.xlu1 %1225  ;;  %1289 = vadd.xlane.f32.xlu1 %v3382_v1 }
 0x2e0   : > { %v1228_v12 = vpop.xlane.xlu0 %1227  ;;  %2748 = vpow2.f32 %v1269_v2  ;;  %v1246_v13 = vsub.f32 %v3344_v10, %v1226_v8  ;;  %1291 = vadd.xlane.f32.xlu0 %v3384_v7 }
 0x2e1   : > { %v1247_v5 = vsub.f32 %v3347_v11, %v1228_v12  ;;  %2750 = vpow2.f32 %v1271_v4  ;;  %v913_v11 = vpop.f32.mrb[19].mxu0 }
 0x2e2   : > { %v3390_v6 = vpop.eup %2740  ;;  %v1273_v17 = vmul.f32 1.442695, %v1246_v13  ;;  %v2636_v35 = vpack.c.bf16 %v2375_v29, %v913_v11  ;;  %v2378_v44 = vpop.f32.mrb[20].mxu0 }
 0x2e3   : > { %v1275_v18 = vmul.f32 1.442695, %v1247_v5  ;;  %v3392_v19 = vpop.eup %2742  ;;  %v1230_v22 = vpop.xlane.xlu1 %1229  ;;  %1293 = vadd.xlane.f32.xlu1 %v3390_v6 }
 0x2e4   : > { %v1232_v23 = vpop.xlane.xlu0 %1231  ;;  %2752 = vpow2.f32 %v1273_v17  ;;  %v1248_v24 = vsub.f32 %v3352_v14, %v1230_v22  ;;  %1295 = vadd.xlane.f32.xlu0 %v3392_v19  ;;  %2637 = vmatprep.subr.bf16.mxu0 %v2636_v35  ;;  %v923_v42 = vpop.f32.mrb[21].mxu0 }
 0x2e5   : > { %v1249_v10 = vsub.f32 %v3355_v15, %v1232_v23  ;;  %2754 = vpow2.f32 %v1275_v18  ;;  %2639 = vmatpush3.bf16.msra.mxu0 %v2636_v35  ;;  %v2640_v49 = vpack.c.bf16 %v2378_v44, %v923_v42  ;;  %v2381_v45 = vpop.f32.mrb[22].mxu0 }
 0x2e6   : > { %v3398_v28 = vpop.eup %2744  ;;  %v1277_v30 = vmul.f32 1.442695, %v1248_v24  ;;  %v933_v47 = vpop.f32.mrb[23].mxu0 }
 0x2e7   : > { %v1279_v31 = vmul.f32 1.442695, %v1249_v10  ;;  %v3400_v43 = vpop.eup %2746  ;;  %1297 = vadd.xlane.f32.xlu1 %v3398_v28  ;;  %v1234_v46 = vpop.xlane.xlu1 %1233  ;;  %2641 = vmatprep.subr.bf16.mxu0 %v2640_v49  ;;  %v2644_v52 = vpack.c.bf16 %v2381_v45, %v933_v47 }
 0x2e8   : > { %2756 = vpow2.f32 %v1277_v30  ;;  %v1250_v14 = vsub.f32 %v3360_v16, %v1234_v46  ;;  %1299 = vadd.xlane.f32.xlu0 %v3400_v43 }
 0x2e9   : > { %2758 = vpow2.f32 %v1279_v31  ;;  %2643 = vmatpush3.bf16.msra.mxu0 %v2640_v49 }
 0x2ea   : > { %v3405_v15 = vpop.eup %2748  ;;  %v1281_v48 = vmul.f32 1.442695, %v1250_v14  ;;  %2645 = vmatprep.subr.bf16.mxu0 %v2644_v52 }
 0x2eb   : > { %v3407_v41 = vpop.eup %2750  ;;  %1301 = vadd.xlane.f32.xlu1 %v3405_v15 }
 0x2ec   : > { %2760 = vpow2.f32 %v1281_v48  ;;  %1303 = vadd.xlane.f32.xlu0 %v3407_v41 }
 0x2ed   : > { %2647 = vmatpush3.bf16.msra.mxu0 %v2644_v52 }
 0x2ee   : > { %v3411_v16 = vpop.eup %2752  ;;  %2494 = vmatprep.subr.mxu0 %v1524_v58 }
 0x2ef   : > { %v3413_v51 = vpop.eup %2754  ;;  %1305 = vadd.xlane.f32.xlu1 %v3411_v16 }
 0x2f0   : > { %1307 = vadd.xlane.f32.xlu0 %v3413_v51 }
 0x2f2   : > { %v3417_v53 = vpop.eup %2756 }
 0x2f3   : > { %v3419_v56 = vpop.eup %2758  ;;  %1309 = vadd.xlane.f32.xlu1 %v3417_v53 }
 0x2f4   : > { %1311 = vadd.xlane.f32.xlu0 %v3419_v56 }
 0x2f6   : > { %v3423_v57 = vpop.eup %2760 }
 0x2f7   : > { %1313 = vadd.xlane.f32.xlu1 %v3423_v57 }
 0x364   : > { %v1284_v50 = vpop.xlane.xlu0 %1283 }
 0x365   : > { %2762 = vrcp.f32 %v1284_v50  ;;  %v1509_v50 = vld [vmem:[#allocation2 + $0x8] sm:$0xff] }
 0x368   : > { %v1286_v55 = vpop.xlane.xlu1 %1285 }
 0x369   : > { %2764 = vrcp.f32 %v1286_v55  ;;  %v1288_v59 = vpop.xlane.xlu0 %1287  ;;  %v1508_v55 = vld [vmem:[#allocation2] sm:$0xff] }
 0x36a   : > { %2766 = vrcp.f32 %v1288_v59 }
 0x36c   : > { %v1290_v60 = vpop.xlane.xlu1 %1289 }
 0x36d   : > { %2768 = vrcp.f32 %v1290_v60  ;;  %v1292_v61 = vpop.xlane.xlu0 %1291 }
 0x36e   : > { %2770 = vrcp.f32 %v1292_v61 }
 0x36f   : > { %v2763_v9 = vpop.eup %2762 }
 0x370   : > { %v1294_v20 = vpop.xlane.xlu1 %1293  ;;  %v1331_v26 = vmul.f32 %v2763_v9, %v3369_v25 }
 0x371   : > { %2772 = vrcp.f32 %v1294_v20  ;;  %v1296_v21 = vpop.xlane.xlu0 %1295  ;;  %v1511_v20 = vld [vmem:[#allocation2 + $0x18] sm:$0xff] }
 0x372   : > { %2774 = vrcp.f32 %v1296_v21  ;;  %1347 = vst [vmem:[%s3042_s1] sm:$0xff] %v1331_v26  ;;  %2470 = vmatprep.mubr.f32.mxu0 %v1331_v26  ;;  %v1510_v26 = vld [vmem:[#allocation2 + $0x10] sm:$0xff] }
 0x373   : > { %v2765_v29 = vpop.eup %2764 }
 0x374   : > { %v2767_v33 = vpop.eup %2766  ;;  %v1332_v27 = vmul.f32 %v2765_v29, %v3374_v38  ;;  %v1298_v32 = vpop.xlane.xlu1 %1297 }
 0x375   : > { %2776 = vrcp.f32 %v1298_v32  ;;  %v1300_v34 = vpop.xlane.xlu0 %1299  ;;  %v1333_v36 = vmul.f32 %v2767_v33, %v3376_v54  ;;  %v1513_v32 = vld [vmem:[#allocation2 + $0x28] sm:$0xff] }
 0x376   : > { %1348 = vst [vmem:[%s3042_s1 + $0x8] sm:$0xff] %v1332_v27  ;;  %2778 = vrcp.f32 %v1300_v34  ;;  %2471 = vmatmul.mubr.f32.vlgmr.msra.gmra.mrb[24].mxu0 %v1332_v27  ;;  %v1512_v34 = vld [vmem:[#allocation2 + $0x20] sm:$0xff] }
 0x377   : > { %v2769_v25 = vpop.eup %2768  ;;  %1349 = vst [vmem:[%s3042_s1 + $0x10] sm:$0xff] %v1333_v36  ;;  %2473 = vmatprep.mubr.f32.mxu0 %v1333_v36  ;;  %2495 = vmatpush3.msra.mxu0 %v1524_v58 }
 0x378   : > { %v2771_v37 = vpop.eup %2770  ;;  %v1302_v39 = vpop.xlane.xlu1 %1301  ;;  %v1334_v40 = vmul.f32 %v2769_v25, %v3382_v1 }
 0x379   : > { %2780 = vrcp.f32 %v1302_v39  ;;  %v1304_v38 = vpop.xlane.xlu0 %1303  ;;  %v1335_v62 = vmul.f32 %v2771_v37, %v3384_v7 }
 0x37a   : > { %2782 = vrcp.f32 %v1304_v38  ;;  %1350 = vst [vmem:[%s3042_s1 + $0x18] sm:$0xff] %v1334_v40  ;;  %2474 = vmatmul.mubr.f32.gmra.mrb[26].mxu0 %v1334_v40  ;;  %v1515_v40 = vld [vmem:[#allocation2 + $0x38] sm:$0xff]  ;;  %v1514_v38 = vld [vmem:[#allocation2 + $0x30] sm:$0xff] }
 0x37b   : > { %v2773_v54 = vpop.eup %2772  ;;  %1351 = vst [vmem:[%s3042_s1 + $0x20] sm:$0xff] %v1335_v62  ;;  %2476 = vmatprep.mubr.f32.mxu0 %v1335_v62 }
 0x37c   : > { %v2775_v63 = vpop.eup %2774  ;;  %v1306_v0 = vpop.xlane.xlu1 %1305  ;;  %v1336_v3 = vmul.f32 %v2773_v54, %v3390_v6 }
 0x37d   : > { %2784 = vrcp.f32 %v1306_v0  ;;  %v1308_v2 = vpop.xlane.xlu0 %1307  ;;  %v1337_v1 = vmul.f32 %v2775_v63, %v3392_v19 }
 0x37e   : > { %2786 = vrcp.f32 %v1308_v2  ;;  %1352 = vst [vmem:[%s3042_s1 + $0x28] sm:$0xff] %v1336_v3  ;;  %2477 = vmatmul.mubr.f32.gmra.mrb[28].mxu0 %v1336_v3  ;;  %v1517_v3 = vld [vmem:[#allocation2 + $0x48] sm:$0xff]  ;;  %v1516_v2 = vld [vmem:[#allocation2 + $0x40] sm:$0xff] }
 0x37f   : > { %v2777_v4 = vpop.eup %2776  ;;  %1353 = vst [vmem:[%s3042_s1 + $0x30] sm:$0xff] %v1337_v1  ;;  %2479 = vmatprep.mubr.f32.mxu0 %v1337_v1 }
 0x380   : > { %v2779_v7 = vpop.eup %2778  ;;  %v1310_v8 = vpop.xlane.xlu1 %1309  ;;  %v1338_v12 = vmul.f32 %v2777_v4, %v3398_v28 }
 0x381   : > { %2788 = vrcp.f32 %v1310_v8  ;;  %v1312_v13 = vpop.xlane.xlu0 %1311  ;;  %v1339_v5 = vmul.f32 %v2779_v7, %v3400_v43 }
 0x382   : > { %2790 = vrcp.f32 %v1312_v13  ;;  %1354 = vst [vmem:[%s3042_s1 + $0x38] sm:$0xff] %v1338_v12  ;;  %2480 = vmatmul.mubr.f32.gmra.mrb[30].mxu0 %v1338_v12  ;;  %v1519_v12 = vld [vmem:[#allocation2 + $0x58] sm:$0xff]  ;;  %v1518_v13 = vld [vmem:[#allocation2 + $0x50] sm:$0xff] }
 0x383   : > { %v2781_v6 = vpop.eup %2780  ;;  %1355 = vst [vmem:[%s3042_s1 + $0x40] sm:$0xff] %v1339_v5  ;;  %2482 = vmatprep.mubr.f32.mxu0 %v1339_v5 }
 0x384   : > { %v2783_v17 = vpop.eup %2782  ;;  %v1314_v18 = vpop.xlane.xlu1 %1313  ;;  %v1340_v19 = vmul.f32 %v2781_v6, %v3405_v15 }
 0x385   : > { %2792 = vrcp.f32 %v1314_v18  ;;  %v1341_v22 = vmul.f32 %v2783_v17, %v3407_v41 }
 0x386   : > { %1356 = vst [vmem:[%s3042_s1 + $0x48] sm:$0xff] %v1340_v19  ;;  %2483 = vmatmul.mubr.f32.gmra.mrb[32].mxu0 %v1340_v19  ;;  %v1521_v19 = vld [vmem:[#allocation2 + $0x68] sm:$0xff] }
 0x387   : > { %v2785_v23 = vpop.eup %2784  ;;  %1357 = vst [vmem:[%s3042_s1 + $0x50] sm:$0xff] %v1341_v22  ;;  %2485 = vmatprep.mubr.f32.mxu0 %v1341_v22  ;;  %v1520_v22 = vld [vmem:[#allocation2 + $0x60] sm:$0xff] }
 0x388   : > { %v2787_v24 = vpop.eup %2786  ;;  %v1342_v10 = vmul.f32 %v2785_v23, %v3411_v16 }
 0x389   : > { %v1343_v11 = vmul.f32 %v2787_v24, %v3413_v51 }
 0x38a   : > { %1358 = vst [vmem:[%s3042_s1 + $0x58] sm:$0xff] %v1342_v10  ;;  %2486 = vmatmul.mubr.f32.gmra.mrb[34].mxu0 %v1342_v10 }
 0x38b   : > { %v2789_v28 = vpop.eup %2788  ;;  %1359 = vst [vmem:[%s3042_s1 + $0x60] sm:$0xff] %v1343_v11  ;;  %2488 = vmatprep.mubr.f32.mxu0 %v1343_v11 }
 0x38c   : > { %v2791_v30 = vpop.eup %2790  ;;  %v1344_v31 = vmul.f32 %v2789_v28, %v3417_v53  ;;  %v1523_v28 = vld [vmem:[#allocation2 + $0x78] sm:$0xff] }
 0x38d   : > { %v1345_v35 = vmul.f32 %v2791_v30, %v3419_v56  ;;  %v1522_v30 = vld [vmem:[#allocation2 + $0x70] sm:$0xff] }
 0x38e   : > { %1360 = vst [vmem:[%s3042_s1 + $0x68] sm:$0xff] %v1344_v31  ;;  %2489 = vmatmul.mubr.f32.gmra.mrb[36].mxu0 %v1344_v31 }
 0x38f   : > { %v2793_v44 = vpop.eup %2792  ;;  %1361 = vst [vmem:[%s3042_s1 + $0x70] sm:$0xff] %v1345_v35  ;;  %2491 = vmatprep.mubr.f32.mxu0 %v1345_v35 }
 0x390   : > { %v1346_v43 = vmul.f32 %v2793_v44, %v3423_v57 }
 0x392   : > { %1362 = vst [vmem:[%s3042_s1 + $0x78] sm:$0xff] %v1346_v43  ;;  %2492 = vmatmul.mubr.f32.gmra.mrb[38].mxu0 %v1346_v43 }
 0x449   : > { %v2472_v46 = vpop.f32.mrb[24].mxu0 }
 0x44a   : > { %v1429_v14 = vpop.f32.mrb[25].mxu0 }
 0x44b   : > { %2496 = vmatprep.mubr.msk.f32.mxu0 %vm942_vm2, %v1429_v14  ;;  %v2097_v14 = vld [vmem:[%s3596_s5] ss:$0 sm:$0xff] (!%p2096_p1) }
 0x44c   : > { %2497 = vmatmul.mubr.msk.f32.vlgmr.msra.gmra.mrb[40].mxu0 %vm942_vm2, %v2472_v46 }
 0x44d   : > { %v2475_v15 = vpop.f32.mrb[26].mxu0 }
 0x44e   : > { %v1439_v48 = vpop.f32.mrb[27].mxu0 }
 0x44f   : > { %2499 = vmatprep.mubr.msk.f32.mxu0 %vm942_vm2, %v1439_v48 }
 0x450   : > { %2500 = vmatmul.mubr.msk.f32.gmra.mrb[42].mxu0 %vm942_vm2, %v2475_v15 }
 0x451   : > { %v2478_v42 = vpop.f32.mrb[28].mxu0 }
 0x452   : > { %v1449_v41 = vpop.f32.mrb[29].mxu0 }
 0x453   : > { %2502 = vmatprep.mubr.msk.f32.mxu0 %vm942_vm2, %v1449_v41 }
 0x454   : > { %2503 = vmatmul.mubr.msk.f32.gmra.mrb[44].mxu0 %vm942_vm2, %v2478_v42 }
 0x455   : > { %v2481_v49 = vpop.f32.mrb[30].mxu0 }
 0x456   : > { %v1459_v45 = vpop.f32.mrb[31].mxu0 }
 0x457   : > { %2505 = vmatprep.mubr.msk.f32.mxu0 %vm942_vm2, %v1459_v45 }
 0x458   : > { %2506 = vmatmul.mubr.msk.f32.gmra.mrb[46].mxu0 %vm942_vm2, %v2481_v49 }
 0x459   : > { %v2484_v16 = vpop.f32.mrb[32].mxu0 }
 0x45a   : > { %v1469_v47 = vpop.f32.mrb[33].mxu0 }
 0x45b   : > { %2508 = vmatprep.mubr.msk.f32.mxu0 %vm942_vm2, %v1469_v47 }
 0x45c   : > { %2509 = vmatmul.mubr.msk.f32.gmra.mrb[48].mxu0 %vm942_vm2, %v2484_v16 }
 0x45d   : > { %v2487_v51 = vpop.f32.mrb[34].mxu0 }
 0x45e   : > { %v1479_v52 = vpop.f32.mrb[35].mxu0 }
 0x45f   : > { %2511 = vmatprep.mubr.msk.f32.mxu0 %vm942_vm2, %v1479_v52 }
 0x460   : > { %2512 = vmatmul.mubr.msk.f32.gmra.mrb[50].mxu0 %vm942_vm2, %v2487_v51 }
 0x461   : > { %v2490_v53 = vpop.f32.mrb[36].mxu0 }
 0x462   : > { %v1489_v56 = vpop.f32.mrb[37].mxu0 }
 0x463   : > { %2514 = vmatprep.mubr.msk.f32.mxu0 %vm942_vm2, %v1489_v56 }
 0x464   : > { %2515 = vmatmul.mubr.msk.f32.gmra.mrb[52].mxu0 %vm942_vm2, %v2490_v53 }
 0x465   : > { %v2493_v57 = vpop.f32.mrb[38].mxu0 }
 0x466   : > { %v1499_v58 = vpop.f32.mrb[39].mxu0 }
 0x467   : > { %2517 = vmatprep.mubr.msk.f32.mxu0 %vm942_vm2, %v1499_v58 }
 0x468   : > { %2518 = vmatmul.mubr.msk.f32.gmra.mrb[54].mxu0 %vm942_vm2, %v2493_v57 }
 0x51f   : > { %v2498_v59 = vpop.f32.mrb[40].mxu0 }
 0x520   : > { %v1719_v60 = vadd.f32 %v2498_v59, %v1509_v50  ;;  %v1639_v61 = vpop.f32.mrb[41].mxu0 }
 0x521   : > { %v1718_v9 = vadd.f32 %v1639_v61, %v1508_v55 }
 0x522   : > { %1735 = vst.msk [vmem:[#allocation2 + $0x8] sm:$0xff] %vm426_vm1, %v1719_v60 }
 0x523   : > { %1734 = vst.msk [vmem:[#allocation2] sm:$0xff] %vm426_vm1, %v1718_v9  ;;  %v2501_v21 = vpop.f32.mrb[42].mxu0 }
 0x524   : > { %v1721_v29 = vadd.f32 %v2501_v21, %v1511_v20  ;;  %v1649_v33 = vpop.f32.mrb[43].mxu0 }
 0x525   : > { %v1720_v27 = vadd.f32 %v1649_v33, %v1510_v26 }
 0x526   : > { %1737 = vst.msk [vmem:[#allocation2 + $0x18] sm:$0xff] %vm426_vm1, %v1721_v29 }
 0x527   : > { %1736 = vst.msk [vmem:[#allocation2 + $0x10] sm:$0xff] %vm426_vm1, %v1720_v27  ;;  %v2504_v36 = vpop.f32.mrb[44].mxu0 }
 0x528   : > { %v1723_v25 = vadd.f32 %v2504_v36, %v1513_v32  ;;  %v1659_v37 = vpop.f32.mrb[45].mxu0 }
 0x529   : > { %v1722_v39 = vadd.f32 %v1659_v37, %v1512_v34  ;;  %v1755_v15 = vld [vmem:[#allocation2 + $0x8] sm:$0xff] (!%p2096_p1) }
 0x52a   : > { %1739 = vst.msk [vmem:[#allocation2 + $0x28] sm:$0xff] %vm426_vm1, %v1723_v25  ;;  %v1754_v46 = vld [vmem:[#allocation2] sm:$0xff] (!%p2096_p1)  ;;  %v1778_v42 = vadd.f32 (!%p2096_p1), %v2097_v14, %v1755_v15 }
 0x52b   : > { %1738 = vst.msk [vmem:[#allocation2 + $0x20] sm:$0xff] %vm426_vm1, %v1722_v39  ;;  %v2507_v62 = vpop.f32.mrb[46].mxu0  ;;  %v1777_v48 = vadd.f32 (!%p2096_p1), %v2097_v14, %v1754_v46 }
 0x52c   : > { %v1725_v54 = vadd.f32 %v2507_v62, %v1515_v40  ;;  %v1669_v63 = vpop.f32.mrb[47].mxu0  ;;  %1794 = vst.msk [vmem:[%s3040_s18 + $0x8] sm:$0xff] (!%p2096_p1), %vm426_vm1, %v1778_v42 }
 0x52d   : > { %v1724_v0 = vadd.f32 %v1669_v63, %v1514_v38  ;;  %v1757_v49 = vld [vmem:[#allocation2 + $0x18] sm:$0xff] (!%p2096_p1)  ;;  %1793 = vst.msk [vmem:[%s3040_s18] sm:$0xff] (!%p2096_p1), %vm426_vm1, %v1777_v48 }
 0x52e   : > { %1741 = vst.msk [vmem:[#allocation2 + $0x38] sm:$0xff] %vm426_vm1, %v1725_v54  ;;  %v1756_v41 = vld [vmem:[#allocation2 + $0x10] sm:$0xff] (!%p2096_p1)  ;;  %v1780_v47 = vadd.f32 (!%p2096_p1), %v2097_v14, %v1757_v49 }
 0x52f   : > { %1740 = vst.msk [vmem:[#allocation2 + $0x30] sm:$0xff] %vm426_vm1, %v1724_v0  ;;  %v2510_v1 = vpop.f32.mrb[48].mxu0  ;;  %v1779_v16 = vadd.f32 (!%p2096_p1), %v2097_v14, %v1756_v41 }
 0x530   : > { %v1727_v4 = vadd.f32 %v2510_v1, %v1517_v3  ;;  %v1679_v7 = vpop.f32.mrb[49].mxu0  ;;  %1796 = vst.msk [vmem:[%s3040_s18 + $0x18] sm:$0xff] (!%p2096_p1), %vm426_vm1, %v1780_v47 }
 0x531   : > { %v1726_v8 = vadd.f32 %v1679_v7, %v1516_v2  ;;  %v1759_v52 = vld [vmem:[#allocation2 + $0x28] sm:$0xff] (!%p2096_p1)  ;;  %1795 = vst.msk [vmem:[%s3040_s18 + $0x10] sm:$0xff] (!%p2096_p1), %vm426_vm1, %v1779_v16 }
 0x532   : > { %1743 = vst.msk [vmem:[#allocation2 + $0x48] sm:$0xff] %vm426_vm1, %v1727_v4  ;;  %v1758_v45 = vld [vmem:[#allocation2 + $0x20] sm:$0xff] (!%p2096_p1)  ;;  %v1782_v57 = vadd.f32 (!%p2096_p1), %v2097_v14, %v1759_v52 }
 0x533   : > { %1742 = vst.msk [vmem:[#allocation2 + $0x40] sm:$0xff] %vm426_vm1, %v1726_v8  ;;  %v2513_v5 = vpop.f32.mrb[50].mxu0  ;;  %v1781_v51 = vadd.f32 (!%p2096_p1), %v2097_v14, %v1758_v45 }
 0x534   : > { %v1729_v6 = vadd.f32 %v2513_v5, %v1519_v12  ;;  %v1689_v17 = vpop.f32.mrb[51].mxu0  ;;  %1798 = vst.msk [vmem:[%s3040_s18 + $0x28] sm:$0xff] (!%p2096_p1), %vm426_vm1, %v1782_v57 }
 0x535   : > { %v1728_v18 = vadd.f32 %v1689_v17, %v1518_v13  ;;  %v1761_v56 = vld [vmem:[#allocation2 + $0x38] sm:$0xff] (!%p2096_p1)  ;;  %1797 = vst.msk [vmem:[%s3040_s18 + $0x20] sm:$0xff] (!%p2096_p1), %vm426_vm1, %v1781_v51 }
 0x536   : > { %1745 = vst.msk [vmem:[#allocation2 + $0x58] sm:$0xff] %vm426_vm1, %v1729_v6  ;;  %v1760_v53 = vld [vmem:[#allocation2 + $0x30] sm:$0xff] (!%p2096_p1)  ;;  %v1784_v50 = vadd.f32 (!%p2096_p1), %v2097_v14, %v1761_v56 }
 0x537   : > { %1744 = vst.msk [vmem:[#allocation2 + $0x50] sm:$0xff] %vm426_vm1, %v1728_v18  ;;  %v2516_v23 = vpop.f32.mrb[52].mxu0  ;;  %v1783_v58 = vadd.f32 (!%p2096_p1), %v2097_v14, %v1760_v53 }
 0x538   : > { %v1731_v24 = vadd.f32 %v2516_v23, %v1521_v19  ;;  %v1699_v10 = vpop.f32.mrb[53].mxu0  ;;  %1800 = vst.msk [vmem:[%s3040_s18 + $0x38] sm:$0xff] (!%p2096_p1), %vm426_vm1, %v1784_v50 }
 0x539   : > { %v1730_v11 = vadd.f32 %v1699_v10, %v1520_v22  ;;  %1753 = sbr.rel (%p2096_p1) target bundleno = 1354 (0x54a), region = 52  ;;  %v1763_v59 = vld [vmem:[#allocation2 + $0x48] sm:$0xff] (!%p2096_p1)  ;;  %1799 = vst.msk [vmem:[%s3040_s18 + $0x30] sm:$0xff] (!%p2096_p1), %vm426_vm1, %v1783_v58 }
 0x53a   : > { %1747 = vst.msk [vmem:[#allocation2 + $0x68] sm:$0xff] %vm426_vm1, %v1731_v24  ;;  %v1762_v55 = vld [vmem:[#allocation2 + $0x40] sm:$0xff] (!%p2096_p1)  ;;  %v1786_v9 = vadd.f32 (!%p2096_p1), %v2097_v14, %v1763_v59 }
 0x53b   : > { %1746 = vst.msk [vmem:[#allocation2 + $0x60] sm:$0xff] %vm426_vm1, %v1730_v11  ;;  %v2519_v31 = vpop.f32.mrb[54].mxu0  ;;  %v1785_v61 = vadd.f32 (!%p2096_p1), %v2097_v14, %v1762_v55 }
 0x53c   : > { %v1733_v35 = vadd.f32 %v2519_v31, %v1523_v28  ;;  %v1709_v44 = vpop.f32.mrb[55].mxu0  ;;  %1802 = vst.msk [vmem:[%s3040_s18 + $0x48] sm:$0xff] (!%p2096_p1), %vm426_vm1, %v1786_v9 }
 0x53d   : > { %v1732_v43 = vadd.f32 %v1709_v44, %v1522_v30  ;;  %v1765_v26 = vld [vmem:[#allocation2 + $0x58] sm:$0xff] (!%p2096_p1)  ;;  %1801 = vst.msk [vmem:[%s3040_s18 + $0x40] sm:$0xff] (!%p2096_p1), %vm426_vm1, %v1785_v61 }
 0x53e   : > { %1749 = vst.msk [vmem:[#allocation2 + $0x78] sm:$0xff] %vm426_vm1, %v1733_v35  ;;  %v1764_v60 = vld [vmem:[#allocation2 + $0x50] sm:$0xff] (!%p2096_p1)  ;;  %v1788_v33 = vadd.f32 (!%p2096_p1), %v2097_v14, %v1765_v26 }
 0x53f   : > { %1748 = vst.msk [vmem:[#allocation2 + $0x70] sm:$0xff] %vm426_vm1, %v1732_v43  ;;  %v1787_v20 = vadd.f32 (!%p2096_p1), %v2097_v14, %v1764_v60 }
 0x540   : > { %1804 = vst.msk [vmem:[%s3040_s18 + $0x58] sm:$0xff] %vm426_vm1, %v1788_v33 }
 0x541   : > { %v1767_v29 = vld [vmem:[#allocation2 + $0x68] sm:$0xff]  ;;  %1803 = vst.msk [vmem:[%s3040_s18 + $0x50] sm:$0xff] %vm426_vm1, %v1787_v20 }
 0x542   : > { %v1766_v21 = vld [vmem:[#allocation2 + $0x60] sm:$0xff]  ;;  %v1790_v32 = vadd.f32 %v2097_v14, %v1767_v29 }
 0x543   : > { %v1789_v27 = vadd.f32 %v2097_v14, %v1766_v21 }
 0x544   : > { %1806 = vst.msk [vmem:[%s3040_s18 + $0x68] sm:$0xff] %vm426_vm1, %v1790_v32 }
 0x545   : > { %v1769_v36 = vld [vmem:[#allocation2 + $0x78] sm:$0xff]  ;;  %1805 = vst.msk [vmem:[%s3040_s18 + $0x60] sm:$0xff] %vm426_vm1, %v1789_v27 }
 0x546   : > { %v1768_v34 = vld [vmem:[#allocation2 + $0x70] sm:$0xff]  ;;  %v1792_v37 = vadd.f32 %v2097_v14, %v1769_v36 }
 0x547   : > { %v1791_v25 = vadd.f32 %v2097_v14, %v1768_v34 }
 0x548   : > { %1808 = vst.msk [vmem:[%s3040_s18 + $0x78] sm:$0xff] %vm426_vm1, %v1792_v37 }
 0x549   : > { %1807 = vst.msk [vmem:[%s3040_s18 + $0x70] sm:$0xff] %vm426_vm1, %v1791_v25 }
 0x54a PF: > { %s2099_s26 = sshll.u32 %s2872_s27, 4  ;;  %s2100_s29 = sshll.u32 %s2876_s28, 7 }
 0x54b   : > { %s1833_s30 = sshll.u32 %s3042_s1, 4  ;;  %s1830_s11 = sadd.s32 %s2100_s29, %s2099_s26  ;;  %s3530_s30 = int_to_ptr.vmem [resolvable:$true] %s1833_s30 }
 0x54c   : > { %s2101_s15 = sshll.u32 %s1830_s11, 7  ;;  %s3623_s23 = sand.u32 1, %s2864_s25  }
 0x54d   : > { %s3535_s21 = scalar_lea.hbm %s3598_s7, %s2101_s15  ;;  %s3539_s9 = scalar_lea.sflag [#allocation4], %s3623_s23 }
 0x54e   : > { %s2794_s16 = scalar_lea.vmem %s3530_s30, 2048  ;;  %s2891_s1 = smov [#allocation3]  }
 0x54f   : > { %p2795_p2 = scmp.ne.s32.totalorder %s3530_s30, %s2794_s16  ;;  %s2798_s27 = sshll.u32 %s2891_s1, 4  ;;  %s2799_s27 = int_to_ptr.vmem [resolvable:$false] %s2798_s27 }
 0x550   : > { %s2800_s28 = scalar_lea.vmem %s2799_s27, 4096  ;;  %p2801_p6 = scmp.lt.s32.totalorder %s3530_s30, %s2799_s27 }
 0x551   : > { %p2796_p4 = pnand %p2795_p2, %p2985_p3  ;;  %p2802_p7 = scmp.lt.s32.totalorder %s2800_s28, %s2794_s16 }
 0x553   : > { %p2797_p5 = pneg %p2796_p4  ;;  %p2803_p9 = por %p2802_p7, %p2801_p6 }
 0x555   : > { %p2804_p10 = pnand %p2803_p9, %p2797_p5 }
 0x557   : > { %2807 = shalt.err (!%p2804_p10)
}
 0x558   : > { %s2808_s17 = scalar_lea.hbm %s3535_s21, 2048  ;;  %s2812_s13 = scalar_lea.hbm %s3598_s7, 32768 }
 0x559   : > { %p2809_p11 = scmp.ne.s32.totalorder %s3535_s21, %s2808_s17  ;;  %p2813_p0 = scmp.lt.u32.totalorder %s3535_s21, %s3598_s7 }
 0x55a   : > { %p2814_p1 = scmp.lt.u32.totalorder %s2812_s13, %s2808_s17  ;;  %p2816_p4 = scmp.lt.u32.totalorder %s2808_s17, %s3535_s21 }
 0x55b   : > { %p2810_p12 = pnand %p2809_p11, %p2985_p3 }
 0x55c   : > { %p2815_p2 = por %p2814_p1, %p2813_p0 }
 0x55d   : > { %p2811_p13 = pneg %p2810_p12 }
 0x55e   : > { %p2817_p5 = por %p2816_p4, %p2815_p2 }
 0x560   : > { %p2818_p6 = pnand %p2817_p5, %p2811_p13 }
 0x562   : > { %2821 = shalt.err (!%p2818_p6)
}
 0x563   : > { %s2892_s0 = smov 128   ;;  %s2893_s24 = smov 8  }
 0x564   : > { %2656 = dma.vmem_to_hbm [thread:$0]  (%p2985_p3), %s3530_s30, 2048, %s3535_s21, %s3539_s9, %s2892_s0, %s2892_s0, %s2893_s24  }
 0x565 PF: > { %s3624_s26 = sld [smem:[#allocation6_spill]]  ;;  %p2662_p7 = scmp.ge.s32.totalorder %s2888_s8, 2 }
 0x567   : > { %p2659_p9 = pnand %p2662_p7, %p2994_p8 }
 0x56b   : > { %s1856_s11 = sand.u32 1, %s3624_s26  }
 0x56c   : > { %s1857_s15 = scalar_lea.sflag [#allocation4], %s1856_s11 }
 0x56d   : > { %2855 = dma.done.wait (!%p2659_p9), %s1857_s15, 2048  }
 0x56e   : > { %2857 = vsyncadd (!%p2659_p9), %s1857_s15, 4294965248  ;;  %s21_s8 = sadd.s32 1, %s2888_s8   ;;  %s3626_s19 = sld [smem:[#allocation7_spill]] }
 0x56f   : > { %p18_p10 = scmp.ge.s32.totalorder %s21_s8, 18   ;;  %s3627_s26 = sld [smem:[#allocation13_spill]] }
 0x570   : > { %s3628_s27 = sld [smem:[#allocation8_spill]]  ;;  %s3629_s28 = sld [smem:[#allocation9_spill]] }
 0x571   : > { %s3630_s29 = sld [smem:[#allocation10_spill]]  ;;  %s3631_s30 = sld [smem:[#allocation11_spill]] }
 0x572   : > { %s3632_s24 = smov %s2864_s25  ;;  %20 = sbr.rel (!%p18_p10) target bundleno = 8 (0x8), region = 111 }
 0x574   : > { %s3633_s25 = smov %s3626_s19 }
 0x579   :  { %1862 = vsyncpa [#allocation4], 1 }
 0x57a   :  { %1864 = vsyncpa [#allocation4 + $0x1], 1 }

</bundles_post_ra>
